<compile_context>
chip_gen: v7x
topology: tpu7x:2x2x1
jax: 0.10.0
libtpu: 0.0.40
codegen_flags: <defaults>
</compile_context>

<pallas_src>
import functools

import jax
import jax.numpy as jnp
import numpy as np
from jax.experimental import pallas as pl
from jax.experimental.pallas import tpu as pltpu

TIME_STEPS = 24
RECURRENT_MAX = 2.0 ** (1.0 / TIME_STEPS)
RECURRENT_MIN = 0.5 ** (1.0 / TIME_STEPS)

H1 = 32          # layer_sizes[0]
H2 = 32          # layer_sizes[1]
N_CLASSES = 10   # nn.Linear(layer_sizes[-1], 10)

G1 = 3 * H1      # 96: packed gate width, order [r | z | c]
G2 = 3 * H2      # 96
UBD_W = 256      # lane width of block-diagonal recurrent weight
UBD_OFF2 = 128   # lane offset of layer-2 gate columns (vreg-aligned split)


def gru_net_kernel(x_ref, pw_ref, ubd_ref, out_ref, *, batch, time):
    B, T = batch, time
    D = x_ref.shape[-1]

    x_tm = x_ref[...]            # (T*B, D) time-major
    pw = pw_ref[...]             # (D+72, 96) packed [W1; W2; WL_pad; biases]
    u_bd = ubd_ref[...]          # (64, 256) block-diag: U1 @ lanes 0:96, U2 @ 128:224

    # --- carve the packed weight buffer (static slices, one-time) ---
    w1 = pw[0:D, :]                               # (D, 96)
    w2 = pw[D:D + H1, :]                          # (32, 96)
    wl = pw[D + H1:D + H1 + H2, :]                # (32, 96); cols >= N_CLASSES are 0
    brow = D + H1 + H2
    b1 = pw[brow:brow + 1, :]                     # (1, 96)
    b2 = pw[brow + 1:brow + 2, :]                 # (1, 96)
    bl = pw[brow + 2:brow + 3, :]                 # (1, 96)

    # --- hoisted layer-1 input projection across ALL timesteps (one matmul) ---
    gx1_all = jnp.dot(x_tm, w1, preferred_element_type=jnp.float32) + b1   # (T*B, 96)

    # hoisted bias broadcast (JAX does not CSE broadcast_in_dim across the unroll)
    b2b = jnp.broadcast_to(b2, (B, G2))

    h1 = jnp.zeros((B, H1), jnp.float32)
    h2 = jnp.zeros((B, H2), jnp.float32)

    # T is a small compile-time constant -> fully unrolled, static slices only.
    for t in range(T):
        gx1 = gx1_all[t * B:(t + 1) * B, :]                           # (B, 96)

        # one block-diagonal MXU push gives both layers' recurrent projections
        h12 = jnp.concatenate([h1, h2], axis=1)                       # (B, 64)
        gh = jnp.dot(h12, u_bd, preferred_element_type=jnp.float32)   # (B, 256)
        gh1 = gh[:, 0:G1]                                             # lanes 0..95
        gh2 = gh[:, UBD_OFF2:UBD_OFF2 + G2]                           # lanes 128..223

        # ---- layer 1 (fused r/z sigmoid) ----
        rz1 = jax.nn.sigmoid(gx1[:, 0:2 * H1] + gh1[:, 0:2 * H1])     # (B, 64)
        r1 = rz1[:, 0:H1]
        z1 = rz1[:, H1:2 * H1]
        c1 = jnp.tanh(gx1[:, 2 * H1:G1] + r1 * gh1[:, 2 * H1:G1])
        h1 = z1 * h1 + (1.0 - z1) * c1

        # ---- layer 2 (input projection from the fresh h1) ----
        gx2 = jnp.dot(h1, w2, preferred_element_type=jnp.float32) + b2b
        rz2 = jax.nn.sigmoid(gx2[:, 0:2 * H2] + gh2[:, 0:2 * H2])
        r2 = rz2[:, 0:H2]
        z2 = rz2[:, H2:2 * H2]
        c2 = jnp.tanh(gx2[:, 2 * H2:G2] + r2 * gh2[:, 2 * H2:G2])
        h2 = z2 * h2 + (1.0 - z2) * c2

    logits = jnp.dot(h2, wl, preferred_element_type=jnp.float32) + bl  # (B, 96)
    out_ref[...] = logits[:, 0:N_CLASSES]


def gru_net_forward(x, packed_w, u_bd):
    """x: (B, T, D_in) batch-first, like the PyTorch module."""
    B, T, D = x.shape
    x = x.astype(jnp.float32)
    # layout plumbing only: time-major flatten so each timestep is a contiguous
    # row block inside the kernel
    x_tm = jnp.transpose(x, (1, 0, 2)).reshape(T * B, D)

    kernel = functools.partial(gru_net_kernel, batch=B, time=T)
    return pl.pallas_call(
        kernel,
        out_shape=jax.ShapeDtypeStruct((B, N_CLASSES), jnp.float32),
        in_specs=[pl.BlockSpec(memory_space=pltpu.MemorySpace.VMEM)] * 3,
        out_specs=pl.BlockSpec(memory_space=pltpu.MemorySpace.VMEM),
    )(x_tm, packed_w, u_bd)


def init_params(key, input_size):
    """Deterministic init mirroring the PyTorch module's init scheme.

    Per-layer weights: W=(D, 3H), U=(H, 3H), b=(1, 3H); gate order [r | z | c].
    """
    ks = jax.random.split(key, 8)
    lim1 = 1.0 / np.sqrt(H1)
    lim2 = 1.0 / np.sqrt(H2)
    # layer 1: recurrent weights ~ U(0, RECURRENT_MAX)
    w1 = jax.random.uniform(ks[0], (input_size, 3 * H1), jnp.float32, -lim1, lim1)
    u1 = jax.random.uniform(ks[1], (H1, 3 * H1), jnp.float32, 0.0, RECURRENT_MAX)
    b1 = jax.random.uniform(ks[2], (1, 3 * H1), jnp.float32, -lim1, lim1)
    # layer 2 (last): recurrent weights ~ U(RECURRENT_MIN, RECURRENT_MAX)
    w2 = jax.random.uniform(ks[3], (H1, 3 * H2), jnp.float32, -lim2, lim2)
    u2 = jax.random.uniform(ks[4], (H2, 3 * H2), jnp.float32, RECURRENT_MIN, RECURRENT_MAX)
    b2 = jax.random.uniform(ks[5], (1, 3 * H2), jnp.float32, -lim2, lim2)
    # final linear: weight ~ N(0, 0.01), bias = 0.1
    wl = 0.01 * jax.random.normal(ks[6], (H2, N_CLASSES), jnp.float32)
    bl = jnp.full((1, N_CLASSES), 0.1, jnp.float32)
    return (w1, u1, b1, w2, u2, b2, wl, bl)


def pack_params(params, input_size):
    """Pack the 8 parameter arrays into 2 contiguous kernel inputs."""
    w1, u1, b1, w2, u2, b2, wl, bl = params
    D = input_size

    wl_pad = jnp.zeros((H2, G2), jnp.float32).at[:, :N_CLASSES].set(wl)
    bl_pad = jnp.zeros((1, G2), jnp.float32).at[:, :N_CLASSES].set(bl)
    bias_blk = jnp.concatenate(
        [b1, b2, bl_pad, jnp.zeros((5, G1), jnp.float32)], axis=0)       # (8, 96)
    packed = jnp.concatenate([w1, w2, wl_pad, bias_blk], axis=0)         # (D+72, 96)

    # block-diagonal recurrent weight, layer-2 columns at a 128-lane offset so
    # the in-kernel split is vreg-aligned (no lane rotate in the serial chain)
    u_bd = jnp.zeros((H1 + H2, UBD_W), jnp.float32)
    u_bd = u_bd.at[0:H1, 0:G1].set(u1)
    u_bd = u_bd.at[H1:H1 + H2, UBD_OFF2:UBD_OFF2 + G2].set(u2)
    return packed, u_bd


def reference_forward(x, params):
    """Pure-JAX reference of the same forward pass (for correctness check)."""
    w1, u1, b1, w2, u2, b2, wl, bl = params
    B = x.shape[0]

    def cell(x_t, h, w, u, b, H):
        gx = x_t @ w + b
        gh = h @ u
        r = jax.nn.sigmoid(gx[:, 0:H] + gh[:, 0:H])
        z = jax.nn.sigmoid(gx[:, H:2 * H] + gh[:, H:2 * H])
        c = jnp.tanh(gx[:, 2 * H:3 * H] + r * gh[:, 2 * H:3 * H])
        return z * h + (1.0 - z) * c

    def step(carry, x_t):
        h1, h2 = carry
        h1 = cell(x_t, h1, w1, u1, b1, H1)
        h2 = cell(h1, h2, w2, u2, b2, H2)
        return (h1, h2), None

    init = (jnp.zeros((B, H1), jnp.float32), jnp.zeros((B, H2), jnp.float32))
    (_, h2), _ = jax.lax.scan(step, init, jnp.transpose(x, (1, 0, 2)))
    return h2 @ wl + bl


if __name__ == "__main__":
    key = jax.random.PRNGKey(0)
    k_x, k_p = jax.random.split(key)

    B, T, D_IN = 4, 8, 16          # small shapes consistent with the module
    x = jax.random.normal(k_x, (B, T, D_IN), jnp.float32)
    params = init_params(k_p, D_IN)
    packed_w, u_bd = pack_params(params, D_IN)

    out = gru_net_forward(x, packed_w, u_bd)
    out = jax.block_until_ready(out)

    ref = reference_forward(x, params)
    assert out.shape == (B, N_CLASSES)
    np.testing.assert_allclose(np.asarray(out), np.asarray(ref), rtol=1e-4, atol=1e-4)

    print("KERNEL_OK")
</pallas_src>

<mosaic_0001>
module attributes {stable_mosaic.version = 11 : i64} {
  func.func @gru_net_kernel(%arg0: memref<32x16xf32, #tpu.memory_space<vmem>>, %arg1: memref<88x96xf32, #tpu.memory_space<vmem>>, %arg2: memref<64x256xf32, #tpu.memory_space<vmem>>, %arg3: memref<4x10xf32, #tpu.memory_space<vmem>>) attributes {dimension_semantics = [], scalar_prefetch = 0 : i64, scratch_operands = 0 : i64, tpu.core_type = #tpu.core_type<tc>} {
    %c0 = arith.constant 0 : index
    %c0_0 = arith.constant 0 : index
    %0 = vector.load %arg0[%c0, %c0_0] : memref<32x16xf32, #tpu.memory_space<vmem>>, vector<32x16xf32>
    %c0_1 = arith.constant 0 : index
    %c0_2 = arith.constant 0 : index
    %1 = vector.load %arg1[%c0_1, %c0_2] : memref<88x96xf32, #tpu.memory_space<vmem>>, vector<88x96xf32>
    %c0_3 = arith.constant 0 : index
    %c0_4 = arith.constant 0 : index
    %2 = vector.load %arg2[%c0_3, %c0_4] : memref<64x256xf32, #tpu.memory_space<vmem>>, vector<64x256xf32>
    %3 = vector.extract_strided_slice %1 {offsets = [0, 0], sizes = [16, 96], strides = [1, 1]} : vector<88x96xf32> to vector<16x96xf32>
    %4 = vector.extract_strided_slice %1 {offsets = [16, 0], sizes = [32, 96], strides = [1, 1]} : vector<88x96xf32> to vector<32x96xf32>
    %5 = vector.extract_strided_slice %1 {offsets = [48, 0], sizes = [32, 96], strides = [1, 1]} : vector<88x96xf32> to vector<32x96xf32>
    %6 = vector.extract_strided_slice %1 {offsets = [80, 0], sizes = [1, 96], strides = [1, 1]} : vector<88x96xf32> to vector<1x96xf32>
    %7 = vector.extract_strided_slice %1 {offsets = [81, 0], sizes = [1, 96], strides = [1, 1]} : vector<88x96xf32> to vector<1x96xf32>
    %8 = vector.extract_strided_slice %1 {offsets = [82, 0], sizes = [1, 96], strides = [1, 1]} : vector<88x96xf32> to vector<1x96xf32>
    %cst = arith.constant dense<0.000000e+00> : vector<32x96xf32>
    %9 = tpu.matmul %0, %3, %cst {dimension_numbers = #tpu.dot_dimension_numbers<[1], [0], [0], [1], [0, 0, 1, 1], [], []>} : vector<32x16xf32>, vector<16x96xf32>, vector<32x96xf32> -> vector<32x96xf32>
    %10 = vector.broadcast %6 : vector<1x96xf32> to vector<32x96xf32>
    %11 = arith.addf %9, %10 : vector<32x96xf32>
    %12 = vector.shape_cast %7 : vector<1x96xf32> to vector<1x96xf32>
    %13 = vector.broadcast %12 : vector<1x96xf32> to vector<4x96xf32>
    %cst_5 = arith.constant 0.000000e+00 : f32
    %14 = vector.broadcast %cst_5 : f32 to vector<4x32xf32>
    %cst_6 = arith.constant 0.000000e+00 : f32
    %15 = vector.broadcast %cst_6 : f32 to vector<4x32xf32>
    %16 = vector.extract_strided_slice %11 {offsets = [0, 0], sizes = [4, 96], strides = [1, 1]} : vector<32x96xf32> to vector<4x96xf32>
    %17 = tpu.concatenate %14, %15 in 1 : vector<4x32xf32>, vector<4x32xf32> -> vector<4x64xf32>
    %cst_7 = arith.constant dense<0.000000e+00> : vector<4x256xf32>
    %18 = tpu.matmul %17, %2, %cst_7 {dimension_numbers = #tpu.dot_dimension_numbers<[1], [0], [0], [1], [0, 0, 1, 1], [], []>} : vector<4x64xf32>, vector<64x256xf32>, vector<4x256xf32> -> vector<4x256xf32>
    %19 = vector.extract_strided_slice %18 {offsets = [0, 0], sizes = [4, 96], strides = [1, 1]} : vector<4x256xf32> to vector<4x96xf32>
    %20 = vector.extract_strided_slice %18 {offsets = [0, 128], sizes = [4, 96], strides = [1, 1]} : vector<4x256xf32> to vector<4x96xf32>
    %21 = vector.extract_strided_slice %16 {offsets = [0, 0], sizes = [4, 64], strides = [1, 1]} : vector<4x96xf32> to vector<4x64xf32>
    %22 = vector.extract_strided_slice %19 {offsets = [0, 0], sizes = [4, 64], strides = [1, 1]} : vector<4x96xf32> to vector<4x64xf32>
    %23 = arith.addf %21, %22 : vector<4x64xf32>
    %24 = arith.negf %23 : vector<4x64xf32>
    %25 = math.exp %24 : vector<4x64xf32>
    %cst_8 = arith.constant 1.000000e+00 : f32
    %26 = vector.broadcast %cst_8 : f32 to vector<4x64xf32>
    %27 = arith.addf %26, %25 : vector<4x64xf32>
    %28 = arith.divf %26, %27 : vector<4x64xf32>
    %29 = vector.extract_strided_slice %28 {offsets = [0, 0], sizes = [4, 32], strides = [1, 1]} : vector<4x64xf32> to vector<4x32xf32>
    %30 = vector.extract_strided_slice %28 {offsets = [0, 32], sizes = [4, 32], strides = [1, 1]} : vector<4x64xf32> to vector<4x32xf32>
    %31 = vector.extract_strided_slice %16 {offsets = [0, 64], sizes = [4, 32], strides = [1, 1]} : vector<4x96xf32> to vector<4x32xf32>
    %32 = vector.extract_strided_slice %19 {offsets = [0, 64], sizes = [4, 32], strides = [1, 1]} : vector<4x96xf32> to vector<4x32xf32>
    %33 = arith.mulf %29, %32 : vector<4x32xf32>
    %34 = arith.addf %31, %33 : vector<4x32xf32>
    %35 = math.tanh %34 : vector<4x32xf32>
    %36 = arith.mulf %30, %14 : vector<4x32xf32>
    %cst_9 = arith.constant 1.000000e+00 : f32
    %37 = vector.broadcast %cst_9 : f32 to vector<4x32xf32>
    %38 = arith.subf %37, %30 : vector<4x32xf32>
    %39 = arith.mulf %38, %35 : vector<4x32xf32>
    %40 = arith.addf %36, %39 : vector<4x32xf32>
    %cst_10 = arith.constant dense<0.000000e+00> : vector<4x96xf32>
    %41 = tpu.matmul %40, %4, %cst_10 {dimension_numbers = #tpu.dot_dimension_numbers<[1], [0], [0], [1], [0, 0, 1, 1], [], []>} : vector<4x32xf32>, vector<32x96xf32>, vector<4x96xf32> -> vector<4x96xf32>
    %42 = arith.addf %41, %13 : vector<4x96xf32>
    %43 = vector.extract_strided_slice %42 {offsets = [0, 0], sizes = [4, 64], strides = [1, 1]} : vector<4x96xf32> to vector<4x64xf32>
    %44 = vector.extract_strided_slice %20 {offsets = [0, 0], sizes = [4, 64], strides = [1, 1]} : vector<4x96xf32> to vector<4x64xf32>
    %45 = arith.addf %43, %44 : vector<4x64xf32>
    %46 = arith.negf %45 : vector<4x64xf32>
    %47 = math.exp %46 : vector<4x64xf32>
    %cst_11 = arith.constant 1.000000e+00 : f32
    %48 = vector.broadcast %cst_11 : f32 to vector<4x64xf32>
    %49 = arith.addf %48, %47 : vector<4x64xf32>
    %50 = arith.divf %48, %49 : vector<4x64xf32>
    %51 = vector.extract_strided_slice %50 {offsets = [0, 0], sizes = [4, 32], strides = [1, 1]} : vector<4x64xf32> to vector<4x32xf32>
    %52 = vector.extract_strided_slice %50 {offsets = [0, 32], sizes = [4, 32], strides = [1, 1]} : vector<4x64xf32> to vector<4x32xf32>
    %53 = vector.extract_strided_slice %42 {offsets = [0, 64], sizes = [4, 32], strides = [1, 1]} : vector<4x96xf32> to vector<4x32xf32>
    %54 = vector.extract_strided_slice %20 {offsets = [0, 64], sizes = [4, 32], strides = [1, 1]} : vector<4x96xf32> to vector<4x32xf32>
    %55 = arith.mulf %51, %54 : vector<4x32xf32>
    %56 = arith.addf %53, %55 : vector<4x32xf32>
    %57 = math.tanh %56 : vector<4x32xf32>
    %58 = arith.mulf %52, %15 : vector<4x32xf32>
    %cst_12 = arith.constant 1.000000e+00 : f32
    %59 = vector.broadcast %cst_12 : f32 to vector<4x32xf32>
    %60 = arith.subf %59, %52 : vector<4x32xf32>
    %61 = arith.mulf %60, %57 : vector<4x32xf32>
    %62 = arith.addf %58, %61 : vector<4x32xf32>
    %63 = vector.extract_strided_slice %11 {offsets = [4, 0], sizes = [4, 96], strides = [1, 1]} : vector<32x96xf32> to vector<4x96xf32>
    %64 = tpu.concatenate %40, %62 in 1 : vector<4x32xf32>, vector<4x32xf32> -> vector<4x64xf32>
    %cst_13 = arith.constant dense<0.000000e+00> : vector<4x256xf32>
    %65 = tpu.matmul %64, %2, %cst_13 {dimension_numbers = #tpu.dot_dimension_numbers<[1], [0], [0], [1], [0, 0, 1, 1], [], []>} : vector<4x64xf32>, vector<64x256xf32>, vector<4x256xf32> -> vector<4x256xf32>
    %66 = vector.extract_strided_slice %65 {offsets = [0, 0], sizes = [4, 96], strides = [1, 1]} : vector<4x256xf32> to vector<4x96xf32>
    %67 = vector.extract_strided_slice %65 {offsets = [0, 128], sizes = [4, 96], strides = [1, 1]} : vector<4x256xf32> to vector<4x96xf32>
    %68 = vector.extract_strided_slice %63 {offsets = [0, 0], sizes = [4, 64], strides = [1, 1]} : vector<4x96xf32> to vector<4x64xf32>
    %69 = vector.extract_strided_slice %66 {offsets = [0, 0], sizes = [4, 64], strides = [1, 1]} : vector<4x96xf32> to vector<4x64xf32>
    %70 = arith.addf %68, %69 : vector<4x64xf32>
    %71 = arith.negf %70 : vector<4x64xf32>
    %72 = math.exp %71 : vector<4x64xf32>
    %cst_14 = arith.constant 1.000000e+00 : f32
    %73 = vector.broadcast %cst_14 : f32 to vector<4x64xf32>
    %74 = arith.addf %73, %72 : vector<4x64xf32>
    %75 = arith.divf %73, %74 : vector<4x64xf32>
    %76 = vector.extract_strided_slice %75 {offsets = [0, 0], sizes = [4, 32], strides = [1, 1]} : vector<4x64xf32> to vector<4x32xf32>
    %77 = vector.extract_strided_slice %75 {offsets = [0, 32], sizes = [4, 32], strides = [1, 1]} : vector<4x64xf32> to vector<4x32xf32>
    %78 = vector.extract_strided_slice %63 {offsets = [0, 64], sizes = [4, 32], strides = [1, 1]} : vector<4x96xf32> to vector<4x32xf32>
    %79 = vector.extract_strided_slice %66 {offsets = [0, 64], sizes = [4, 32], strides = [1, 1]} : vector<4x96xf32> to vector<4x32xf32>
    %80 = arith.mulf %76, %79 : vector<4x32xf32>
    %81 = arith.addf %78, %80 : vector<4x32xf32>
    %82 = math.tanh %81 : vector<4x32xf32>
    %83 = arith.mulf %77, %40 : vector<4x32xf32>
    %cst_15 = arith.constant 1.000000e+00 : f32
    %84 = vector.broadcast %cst_15 : f32 to vector<4x32xf32>
    %85 = arith.subf %84, %77 : vector<4x32xf32>
    %86 = arith.mulf %85, %82 : vector<4x32xf32>
    %87 = arith.addf %83, %86 : vector<4x32xf32>
    %cst_16 = arith.constant dense<0.000000e+00> : vector<4x96xf32>
    %88 = tpu.matmul %87, %4, %cst_16 {dimension_numbers = #tpu.dot_dimension_numbers<[1], [0], [0], [1], [0, 0, 1, 1], [], []>} : vector<4x32xf32>, vector<32x96xf32>, vector<4x96xf32> -> vector<4x96xf32>
    %89 = arith.addf %88, %13 : vector<4x96xf32>
    %90 = vector.extract_strided_slice %89 {offsets = [0, 0], sizes = [4, 64], strides = [1, 1]} : vector<4x96xf32> to vector<4x64xf32>
    %91 = vector.extract_strided_slice %67 {offsets = [0, 0], sizes = [4, 64], strides = [1, 1]} : vector<4x96xf32> to vector<4x64xf32>
    %92 = arith.addf %90, %91 : vector<4x64xf32>
    %93 = arith.negf %92 : vector<4x64xf32>
    %94 = math.exp %93 : vector<4x64xf32>
    %cst_17 = arith.constant 1.000000e+00 : f32
    %95 = vector.broadcast %cst_17 : f32 to vector<4x64xf32>
    %96 = arith.addf %95, %94 : vector<4x64xf32>
    %97 = arith.divf %95, %96 : vector<4x64xf32>
    %98 = vector.extract_strided_slice %97 {offsets = [0, 0], sizes = [4, 32], strides = [1, 1]} : vector<4x64xf32> to vector<4x32xf32>
    %99 = vector.extract_strided_slice %97 {offsets = [0, 32], sizes = [4, 32], strides = [1, 1]} : vector<4x64xf32> to vector<4x32xf32>
    %100 = vector.extract_strided_slice %89 {offsets = [0, 64], sizes = [4, 32], strides = [1, 1]} : vector<4x96xf32> to vector<4x32xf32>
    %101 = vector.extract_strided_slice %67 {offsets = [0, 64], sizes = [4, 32], strides = [1, 1]} : vector<4x96xf32> to vector<4x32xf32>
    %102 = arith.mulf %98, %101 : vector<4x32xf32>
    %103 = arith.addf %100, %102 : vector<4x32xf32>
    %104 = math.tanh %103 : vector<4x32xf32>
    %105 = arith.mulf %99, %62 : vector<4x32xf32>
    %cst_18 = arith.constant 1.000000e+00 : f32
    %106 = vector.broadcast %cst_18 : f32 to vector<4x32xf32>
    %107 = arith.subf %106, %99 : vector<4x32xf32>
    %108 = arith.mulf %107, %104 : vector<4x32xf32>
    %109 = arith.addf %105, %108 : vector<4x32xf32>
    %110 = vector.extract_strided_slice %11 {offsets = [8, 0], sizes = [4, 96], strides = [1, 1]} : vector<32x96xf32> to vector<4x96xf32>
    %111 = tpu.concatenate %87, %109 in 1 : vector<4x32xf32>, vector<4x32xf32> -> vector<4x64xf32>
    %cst_19 = arith.constant dense<0.000000e+00> : vector<4x256xf32>
    %112 = tpu.matmul %111, %2, %cst_19 {dimension_numbers = #tpu.dot_dimension_numbers<[1], [0], [0], [1], [0, 0, 1, 1], [], []>} : vector<4x64xf32>, vector<64x256xf32>, vector<4x256xf32> -> vector<4x256xf32>
    %113 = vector.extract_strided_slice %112 {offsets = [0, 0], sizes = [4, 96], strides = [1, 1]} : vector<4x256xf32> to vector<4x96xf32>
    %114 = vector.extract_strided_slice %112 {offsets = [0, 128], sizes = [4, 96], strides = [1, 1]} : vector<4x256xf32> to vector<4x96xf32>
    %115 = vector.extract_strided_slice %110 {offsets = [0, 0], sizes = [4, 64], strides = [1, 1]} : vector<4x96xf32> to vector<4x64xf32>
    %116 = vector.extract_strided_slice %113 {offsets = [0, 0], sizes = [4, 64], strides = [1, 1]} : vector<4x96xf32> to vector<4x64xf32>
    %117 = arith.addf %115, %116 : vector<4x64xf32>
    %118 = arith.negf %117 : vector<4x64xf32>
    %119 = math.exp %118 : vector<4x64xf32>
    %cst_20 = arith.constant 1.000000e+00 : f32
    %120 = vector.broadcast %cst_20 : f32 to vector<4x64xf32>
    %121 = arith.addf %120, %119 : vector<4x64xf32>
    %122 = arith.divf %120, %121 : vector<4x64xf32>
    %123 = vector.extract_strided_slice %122 {offsets = [0, 0], sizes = [4, 32], strides = [1, 1]} : vector<4x64xf32> to vector<4x32xf32>
    %124 = vector.extract_strided_slice %122 {offsets = [0, 32], sizes = [4, 32], strides = [1, 1]} : vector<4x64xf32> to vector<4x32xf32>
    %125 = vector.extract_strided_slice %110 {offsets = [0, 64], sizes = [4, 32], strides = [1, 1]} : vector<4x96xf32> to vector<4x32xf32>
    %126 = vector.extract_strided_slice %113 {offsets = [0, 64], sizes = [4, 32], strides = [1, 1]} : vector<4x96xf32> to vector<4x32xf32>
    %127 = arith.mulf %123, %126 : vector<4x32xf32>
    %128 = arith.addf %125, %127 : vector<4x32xf32>
    %129 = math.tanh %128 : vector<4x32xf32>
    %130 = arith.mulf %124, %87 : vector<4x32xf32>
    %cst_21 = arith.constant 1.000000e+00 : f32
    %131 = vector.broadcast %cst_21 : f32 to vector<4x32xf32>
    %132 = arith.subf %131, %124 : vector<4x32xf32>
    %133 = arith.mulf %132, %129 : vector<4x32xf32>
    %134 = arith.addf %130, %133 : vector<4x32xf32>
    %cst_22 = arith.constant dense<0.000000e+00> : vector<4x96xf32>
    %135 = tpu.matmul %134, %4, %cst_22 {dimension_numbers = #tpu.dot_dimension_numbers<[1], [0], [0], [1], [0, 0, 1, 1], [], []>} : vector<4x32xf32>, vector<32x96xf32>, vector<4x96xf32> -> vector<4x96xf32>
    %136 = arith.addf %135, %13 : vector<4x96xf32>
    %137 = vector.extract_strided_slice %136 {offsets = [0, 0], sizes = [4, 64], strides = [1, 1]} : vector<4x96xf32> to vector<4x64xf32>
    %138 = vector.extract_strided_slice %114 {offsets = [0, 0], sizes = [4, 64], strides = [1, 1]} : vector<4x96xf32> to vector<4x64xf32>
    %139 = arith.addf %137, %138 : vector<4x64xf32>
    %140 = arith.negf %139 : vector<4x64xf32>
    %141 = math.exp %140 : vector<4x64xf32>
    %cst_23 = arith.constant 1.000000e+00 : f32
    %142 = vector.broadcast %cst_23 : f32 to vector<4x64xf32>
    %143 = arith.addf %142, %141 : vector<4x64xf32>
    %144 = arith.divf %142, %143 : vector<4x64xf32>
    %145 = vector.extract_strided_slice %144 {offsets = [0, 0], sizes = [4, 32], strides = [1, 1]} : vector<4x64xf32> to vector<4x32xf32>
    %146 = vector.extract_strided_slice %144 {offsets = [0, 32], sizes = [4, 32], strides = [1, 1]} : vector<4x64xf32> to vector<4x32xf32>
    %147 = vector.extract_strided_slice %136 {offsets = [0, 64], sizes = [4, 32], strides = [1, 1]} : vector<4x96xf32> to vector<4x32xf32>
    %148 = vector.extract_strided_slice %114 {offsets = [0, 64], sizes = [4, 32], strides = [1, 1]} : vector<4x96xf32> to vector<4x32xf32>
    %149 = arith.mulf %145, %148 : vector<4x32xf32>
    %150 = arith.addf %147, %149 : vector<4x32xf32>
    %151 = math.tanh %150 : vector<4x32xf32>
    %152 = arith.mulf %146, %109 : vector<4x32xf32>
    %cst_24 = arith.constant 1.000000e+00 : f32
    %153 = vector.broadcast %cst_24 : f32 to vector<4x32xf32>
    %154 = arith.subf %153, %146 : vector<4x32xf32>
    %155 = arith.mulf %154, %151 : vector<4x32xf32>
    %156 = arith.addf %152, %155 : vector<4x32xf32>
    %157 = vector.extract_strided_slice %11 {offsets = [12, 0], sizes = [4, 96], strides = [1, 1]} : vector<32x96xf32> to vector<4x96xf32>
    %158 = tpu.concatenate %134, %156 in 1 : vector<4x32xf32>, vector<4x32xf32> -> vector<4x64xf32>
    %cst_25 = arith.constant dense<0.000000e+00> : vector<4x256xf32>
    %159 = tpu.matmul %158, %2, %cst_25 {dimension_numbers = #tpu.dot_dimension_numbers<[1], [0], [0], [1], [0, 0, 1, 1], [], []>} : vector<4x64xf32>, vector<64x256xf32>, vector<4x256xf32> -> vector<4x256xf32>
    %160 = vector.extract_strided_slice %159 {offsets = [0, 0], sizes = [4, 96], strides = [1, 1]} : vector<4x256xf32> to vector<4x96xf32>
    %161 = vector.extract_strided_slice %159 {offsets = [0, 128], sizes = [4, 96], strides = [1, 1]} : vector<4x256xf32> to vector<4x96xf32>
    %162 = vector.extract_strided_slice %157 {offsets = [0, 0], sizes = [4, 64], strides = [1, 1]} : vector<4x96xf32> to vector<4x64xf32>
    %163 = vector.extract_strided_slice %160 {offsets = [0, 0], sizes = [4, 64], strides = [1, 1]} : vector<4x96xf32> to vector<4x64xf32>
    %164 = arith.addf %162, %163 : vector<4x64xf32>
    %165 = arith.negf %164 : vector<4x64xf32>
    %166 = math.exp %165 : vector<4x64xf32>
    %cst_26 = arith.constant 1.000000e+00 : f32
    %167 = vector.broadcast %cst_26 : f32 to vector<4x64xf32>
    %168 = arith.addf %167, %166 : vector<4x64xf32>
    %169 = arith.divf %167, %168 : vector<4x64xf32>
    %170 = vector.extract_strided_slice %169 {offsets = [0, 0], sizes = [4, 32], strides = [1, 1]} : vector<4x64xf32> to vector<4x32xf32>
    %171 = vector.extract_strided_slice %169 {offsets = [0, 32], sizes = [4, 32], strides = [1, 1]} : vector<4x64xf32> to vector<4x32xf32>
    %172 = vector.extract_strided_slice %157 {offsets = [0, 64], sizes = [4, 32], strides = [1, 1]} : vector<4x96xf32> to vector<4x32xf32>
    %173 = vector.extract_strided_slice %160 {offsets = [0, 64], sizes = [4, 32], strides = [1, 1]} : vector<4x96xf32> to vector<4x32xf32>
    %174 = arith.mulf %170, %173 : vector<4x32xf32>
    %175 = arith.addf %172, %174 : vector<4x32xf32>
    %176 = math.tanh %175 : vector<4x32xf32>
    %177 = arith.mulf %171, %134 : vector<4x32xf32>
    %cst_27 = arith.constant 1.000000e+00 : f32
    %178 = vector.broadcast %cst_27 : f32 to vector<4x32xf32>
    %179 = arith.subf %178, %171 : vector<4x32xf32>
    %180 = arith.mulf %179, %176 : vector<4x32xf32>
    %181 = arith.addf %177, %180 : vector<4x32xf32>
    %cst_28 = arith.constant dense<0.000000e+00> : vector<4x96xf32>
    %182 = tpu.matmul %181, %4, %cst_28 {dimension_numbers = #tpu.dot_dimension_numbers<[1], [0], [0], [1], [0, 0, 1, 1], [], []>} : vector<4x32xf32>, vector<32x96xf32>, vector<4x96xf32> -> vector<4x96xf32>
    %183 = arith.addf %182, %13 : vector<4x96xf32>
    %184 = vector.extract_strided_slice %183 {offsets = [0, 0], sizes = [4, 64], strides = [1, 1]} : vector<4x96xf32> to vector<4x64xf32>
    %185 = vector.extract_strided_slice %161 {offsets = [0, 0], sizes = [4, 64], strides = [1, 1]} : vector<4x96xf32> to vector<4x64xf32>
    %186 = arith.addf %184, %185 : vector<4x64xf32>
    %187 = arith.negf %186 : vector<4x64xf32>
    %188 = math.exp %187 : vector<4x64xf32>
    %cst_29 = arith.constant 1.000000e+00 : f32
    %189 = vector.broadcast %cst_29 : f32 to vector<4x64xf32>
    %190 = arith.addf %189, %188 : vector<4x64xf32>
    %191 = arith.divf %189, %190 : vector<4x64xf32>
    %192 = vector.extract_strided_slice %191 {offsets = [0, 0], sizes = [4, 32], strides = [1, 1]} : vector<4x64xf32> to vector<4x32xf32>
    %193 = vector.extract_strided_slice %191 {offsets = [0, 32], sizes = [4, 32], strides = [1, 1]} : vector<4x64xf32> to vector<4x32xf32>
    %194 = vector.extract_strided_slice %183 {offsets = [0, 64], sizes = [4, 32], strides = [1, 1]} : vector<4x96xf32> to vector<4x32xf32>
    %195 = vector.extract_strided_slice %161 {offsets = [0, 64], sizes = [4, 32], strides = [1, 1]} : vector<4x96xf32> to vector<4x32xf32>
    %196 = arith.mulf %192, %195 : vector<4x32xf32>
    %197 = arith.addf %194, %196 : vector<4x32xf32>
    %198 = math.tanh %197 : vector<4x32xf32>
    %199 = arith.mulf %193, %156 : vector<4x32xf32>
    %cst_30 = arith.constant 1.000000e+00 : f32
    %200 = vector.broadcast %cst_30 : f32 to vector<4x32xf32>
    %201 = arith.subf %200, %193 : vector<4x32xf32>
    %202 = arith.mulf %201, %198 : vector<4x32xf32>
    %203 = arith.addf %199, %202 : vector<4x32xf32>
    %204 = vector.extract_strided_slice %11 {offsets = [16, 0], sizes = [4, 96], strides = [1, 1]} : vector<32x96xf32> to vector<4x96xf32>
    %205 = tpu.concatenate %181, %203 in 1 : vector<4x32xf32>, vector<4x32xf32> -> vector<4x64xf32>
    %cst_31 = arith.constant dense<0.000000e+00> : vector<4x256xf32>
    %206 = tpu.matmul %205, %2, %cst_31 {dimension_numbers = #tpu.dot_dimension_numbers<[1], [0], [0], [1], [0, 0, 1, 1], [], []>} : vector<4x64xf32>, vector<64x256xf32>, vector<4x256xf32> -> vector<4x256xf32>
    %207 = vector.extract_strided_slice %206 {offsets = [0, 0], sizes = [4, 96], strides = [1, 1]} : vector<4x256xf32> to vector<4x96xf32>
    %208 = vector.extract_strided_slice %206 {offsets = [0, 128], sizes = [4, 96], strides = [1, 1]} : vector<4x256xf32> to vector<4x96xf32>
    %209 = vector.extract_strided_slice %204 {offsets = [0, 0], sizes = [4, 64], strides = [1, 1]} : vector<4x96xf32> to vector<4x64xf32>
    %210 = vector.extract_strided_slice %207 {offsets = [0, 0], sizes = [4, 64], strides = [1, 1]} : vector<4x96xf32> to vector<4x64xf32>
    %211 = arith.addf %209, %210 : vector<4x64xf32>
    %212 = arith.negf %211 : vector<4x64xf32>
    %213 = math.exp %212 : vector<4x64xf32>
    %cst_32 = arith.constant 1.000000e+00 : f32
    %214 = vector.broadcast %cst_32 : f32 to vector<4x64xf32>
    %215 = arith.addf %214, %213 : vector<4x64xf32>
    %216 = arith.divf %214, %215 : vector<4x64xf32>
    %217 = vector.extract_strided_slice %216 {offsets = [0, 0], sizes = [4, 32], strides = [1, 1]} : vector<4x64xf32> to vector<4x32xf32>
    %218 = vector.extract_strided_slice %216 {offsets = [0, 32], sizes = [4, 32], strides = [1, 1]} : vector<4x64xf32> to vector<4x32xf32>
    %219 = vector.extract_strided_slice %204 {offsets = [0, 64], sizes = [4, 32], strides = [1, 1]} : vector<4x96xf32> to vector<4x32xf32>
    %220 = vector.extract_strided_slice %207 {offsets = [0, 64], sizes = [4, 32], strides = [1, 1]} : vector<4x96xf32> to vector<4x32xf32>
    %221 = arith.mulf %217, %220 : vector<4x32xf32>
    %222 = arith.addf %219, %221 : vector<4x32xf32>
    %223 = math.tanh %222 : vector<4x32xf32>
    %224 = arith.mulf %218, %181 : vector<4x32xf32>
    %cst_33 = arith.constant 1.000000e+00 : f32
    %225 = vector.broadcast %cst_33 : f32 to vector<4x32xf32>
    %226 = arith.subf %225, %218 : vector<4x32xf32>
    %227 = arith.mulf %226, %223 : vector<4x32xf32>
    %228 = arith.addf %224, %227 : vector<4x32xf32>
    %cst_34 = arith.constant dense<0.000000e+00> : vector<4x96xf32>
    %229 = tpu.matmul %228, %4, %cst_34 {dimension_numbers = #tpu.dot_dimension_numbers<[1], [0], [0], [1], [0, 0, 1, 1], [], []>} : vector<4x32xf32>, vector<32x96xf32>, vector<4x96xf32> -> vector<4x96xf32>
    %230 = arith.addf %229, %13 : vector<4x96xf32>
    %231 = vector.extract_strided_slice %230 {offsets = [0, 0], sizes = [4, 64], strides = [1, 1]} : vector<4x96xf32> to vector<4x64xf32>
    %232 = vector.extract_strided_slice %208 {offsets = [0, 0], sizes = [4, 64], strides = [1, 1]} : vector<4x96xf32> to vector<4x64xf32>
    %233 = arith.addf %231, %232 : vector<4x64xf32>
    %234 = arith.negf %233 : vector<4x64xf32>
    %235 = math.exp %234 : vector<4x64xf32>
    %cst_35 = arith.constant 1.000000e+00 : f32
    %236 = vector.broadcast %cst_35 : f32 to vector<4x64xf32>
    %237 = arith.addf %236, %235 : vector<4x64xf32>
    %238 = arith.divf %236, %237 : vector<4x64xf32>
    %239 = vector.extract_strided_slice %238 {offsets = [0, 0], sizes = [4, 32], strides = [1, 1]} : vector<4x64xf32> to vector<4x32xf32>
    %240 = vector.extract_strided_slice %238 {offsets = [0, 32], sizes = [4, 32], strides = [1, 1]} : vector<4x64xf32> to vector<4x32xf32>
    %241 = vector.extract_strided_slice %230 {offsets = [0, 64], sizes = [4, 32], strides = [1, 1]} : vector<4x96xf32> to vector<4x32xf32>
    %242 = vector.extract_strided_slice %208 {offsets = [0, 64], sizes = [4, 32], strides = [1, 1]} : vector<4x96xf32> to vector<4x32xf32>
    %243 = arith.mulf %239, %242 : vector<4x32xf32>
    %244 = arith.addf %241, %243 : vector<4x32xf32>
    %245 = math.tanh %244 : vector<4x32xf32>
    %246 = arith.mulf %240, %203 : vector<4x32xf32>
    %cst_36 = arith.constant 1.000000e+00 : f32
    %247 = vector.broadcast %cst_36 : f32 to vector<4x32xf32>
    %248 = arith.subf %247, %240 : vector<4x32xf32>
    %249 = arith.mulf %248, %245 : vector<4x32xf32>
    %250 = arith.addf %246, %249 : vector<4x32xf32>
    %251 = vector.extract_strided_slice %11 {offsets = [20, 0], sizes = [4, 96], strides = [1, 1]} : vector<32x96xf32> to vector<4x96xf32>
    %252 = tpu.concatenate %228, %250 in 1 : vector<4x32xf32>, vector<4x32xf32> -> vector<4x64xf32>
    %cst_37 = arith.constant dense<0.000000e+00> : vector<4x256xf32>
    %253 = tpu.matmul %252, %2, %cst_37 {dimension_numbers = #tpu.dot_dimension_numbers<[1], [0], [0], [1], [0, 0, 1, 1], [], []>} : vector<4x64xf32>, vector<64x256xf32>, vector<4x256xf32> -> vector<4x256xf32>
    %254 = vector.extract_strided_slice %253 {offsets = [0, 0], sizes = [4, 96], strides = [1, 1]} : vector<4x256xf32> to vector<4x96xf32>
    %255 = vector.extract_strided_slice %253 {offsets = [0, 128], sizes = [4, 96], strides = [1, 1]} : vector<4x256xf32> to vector<4x96xf32>
    %256 = vector.extract_strided_slice %251 {offsets = [0, 0], sizes = [4, 64], strides = [1, 1]} : vector<4x96xf32> to vector<4x64xf32>
    %257 = vector.extract_strided_slice %254 {offsets = [0, 0], sizes = [4, 64], strides = [1, 1]} : vector<4x96xf32> to vector<4x64xf32>
    %258 = arith.addf %256, %257 : vector<4x64xf32>
    %259 = arith.negf %258 : vector<4x64xf32>
    %260 = math.exp %259 : vector<4x64xf32>
    %cst_38 = arith.constant 1.000000e+00 : f32
    %261 = vector.broadcast %cst_38 : f32 to vector<4x64xf32>
    %262 = arith.addf %261, %260 : vector<4x64xf32>
    %263 = arith.divf %261, %262 : vector<4x64xf32>
    %264 = vector.extract_strided_slice %263 {offsets = [0, 0], sizes = [4, 32], strides = [1, 1]} : vector<4x64xf32> to vector<4x32xf32>
    %265 = vector.extract_strided_slice %263 {offsets = [0, 32], sizes = [4, 32], strides = [1, 1]} : vector<4x64xf32> to vector<4x32xf32>
    %266 = vector.extract_strided_slice %251 {offsets = [0, 64], sizes = [4, 32], strides = [1, 1]} : vector<4x96xf32> to vector<4x32xf32>
    %267 = vector.extract_strided_slice %254 {offsets = [0, 64], sizes = [4, 32], strides = [1, 1]} : vector<4x96xf32> to vector<4x32xf32>
    %268 = arith.mulf %264, %267 : vector<4x32xf32>
    %269 = arith.addf %266, %268 : vector<4x32xf32>
    %270 = math.tanh %269 : vector<4x32xf32>
    %271 = arith.mulf %265, %228 : vector<4x32xf32>
    %cst_39 = arith.constant 1.000000e+00 : f32
    %272 = vector.broadcast %cst_39 : f32 to vector<4x32xf32>
    %273 = arith.subf %272, %265 : vector<4x32xf32>
    %274 = arith.mulf %273, %270 : vector<4x32xf32>
    %275 = arith.addf %271, %274 : vector<4x32xf32>
    %cst_40 = arith.constant dense<0.000000e+00> : vector<4x96xf32>
    %276 = tpu.matmul %275, %4, %cst_40 {dimension_numbers = #tpu.dot_dimension_numbers<[1], [0], [0], [1], [0, 0, 1, 1], [], []>} : vector<4x32xf32>, vector<32x96xf32>, vector<4x96xf32> -> vector<4x96xf32>
    %277 = arith.addf %276, %13 : vector<4x96xf32>
    %278 = vector.extract_strided_slice %277 {offsets = [0, 0], sizes = [4, 64], strides = [1, 1]} : vector<4x96xf32> to vector<4x64xf32>
    %279 = vector.extract_strided_slice %255 {offsets = [0, 0], sizes = [4, 64], strides = [1, 1]} : vector<4x96xf32> to vector<4x64xf32>
    %280 = arith.addf %278, %279 : vector<4x64xf32>
    %281 = arith.negf %280 : vector<4x64xf32>
    %282 = math.exp %281 : vector<4x64xf32>
    %cst_41 = arith.constant 1.000000e+00 : f32
    %283 = vector.broadcast %cst_41 : f32 to vector<4x64xf32>
    %284 = arith.addf %283, %282 : vector<4x64xf32>
    %285 = arith.divf %283, %284 : vector<4x64xf32>
    %286 = vector.extract_strided_slice %285 {offsets = [0, 0], sizes = [4, 32], strides = [1, 1]} : vector<4x64xf32> to vector<4x32xf32>
    %287 = vector.extract_strided_slice %285 {offsets = [0, 32], sizes = [4, 32], strides = [1, 1]} : vector<4x64xf32> to vector<4x32xf32>
    %288 = vector.extract_strided_slice %277 {offsets = [0, 64], sizes = [4, 32], strides = [1, 1]} : vector<4x96xf32> to vector<4x32xf32>
    %289 = vector.extract_strided_slice %255 {offsets = [0, 64], sizes = [4, 32], strides = [1, 1]} : vector<4x96xf32> to vector<4x32xf32>
    %290 = arith.mulf %286, %289 : vector<4x32xf32>
    %291 = arith.addf %288, %290 : vector<4x32xf32>
    %292 = math.tanh %291 : vector<4x32xf32>
    %293 = arith.mulf %287, %250 : vector<4x32xf32>
    %cst_42 = arith.constant 1.000000e+00 : f32
    %294 = vector.broadcast %cst_42 : f32 to vector<4x32xf32>
    %295 = arith.subf %294, %287 : vector<4x32xf32>
    %296 = arith.mulf %295, %292 : vector<4x32xf32>
    %297 = arith.addf %293, %296 : vector<4x32xf32>
    %298 = vector.extract_strided_slice %11 {offsets = [24, 0], sizes = [4, 96], strides = [1, 1]} : vector<32x96xf32> to vector<4x96xf32>
    %299 = tpu.concatenate %275, %297 in 1 : vector<4x32xf32>, vector<4x32xf32> -> vector<4x64xf32>
    %cst_43 = arith.constant dense<0.000000e+00> : vector<4x256xf32>
    %300 = tpu.matmul %299, %2, %cst_43 {dimension_numbers = #tpu.dot_dimension_numbers<[1], [0], [0], [1], [0, 0, 1, 1], [], []>} : vector<4x64xf32>, vector<64x256xf32>, vector<4x256xf32> -> vector<4x256xf32>
    %301 = vector.extract_strided_slice %300 {offsets = [0, 0], sizes = [4, 96], strides = [1, 1]} : vector<4x256xf32> to vector<4x96xf32>
    %302 = vector.extract_strided_slice %300 {offsets = [0, 128], sizes = [4, 96], strides = [1, 1]} : vector<4x256xf32> to vector<4x96xf32>
    %303 = vector.extract_strided_slice %298 {offsets = [0, 0], sizes = [4, 64], strides = [1, 1]} : vector<4x96xf32> to vector<4x64xf32>
    %304 = vector.extract_strided_slice %301 {offsets = [0, 0], sizes = [4, 64], strides = [1, 1]} : vector<4x96xf32> to vector<4x64xf32>
    %305 = arith.addf %303, %304 : vector<4x64xf32>
    %306 = arith.negf %305 : vector<4x64xf32>
    %307 = math.exp %306 : vector<4x64xf32>
    %cst_44 = arith.constant 1.000000e+00 : f32
    %308 = vector.broadcast %cst_44 : f32 to vector<4x64xf32>
    %309 = arith.addf %308, %307 : vector<4x64xf32>
    %310 = arith.divf %308, %309 : vector<4x64xf32>
    %311 = vector.extract_strided_slice %310 {offsets = [0, 0], sizes = [4, 32], strides = [1, 1]} : vector<4x64xf32> to vector<4x32xf32>
    %312 = vector.extract_strided_slice %310 {offsets = [0, 32], sizes = [4, 32], strides = [1, 1]} : vector<4x64xf32> to vector<4x32xf32>
    %313 = vector.extract_strided_slice %298 {offsets = [0, 64], sizes = [4, 32], strides = [1, 1]} : vector<4x96xf32> to vector<4x32xf32>
    %314 = vector.extract_strided_slice %301 {offsets = [0, 64], sizes = [4, 32], strides = [1, 1]} : vector<4x96xf32> to vector<4x32xf32>
    %315 = arith.mulf %311, %314 : vector<4x32xf32>
    %316 = arith.addf %313, %315 : vector<4x32xf32>
    %317 = math.tanh %316 : vector<4x32xf32>
    %318 = arith.mulf %312, %275 : vector<4x32xf32>
    %cst_45 = arith.constant 1.000000e+00 : f32
    %319 = vector.broadcast %cst_45 : f32 to vector<4x32xf32>
    %320 = arith.subf %319, %312 : vector<4x32xf32>
    %321 = arith.mulf %320, %317 : vector<4x32xf32>
    %322 = arith.addf %318, %321 : vector<4x32xf32>
    %cst_46 = arith.constant dense<0.000000e+00> : vector<4x96xf32>
    %323 = tpu.matmul %322, %4, %cst_46 {dimension_numbers = #tpu.dot_dimension_numbers<[1], [0], [0], [1], [0, 0, 1, 1], [], []>} : vector<4x32xf32>, vector<32x96xf32>, vector<4x96xf32> -> vector<4x96xf32>
    %324 = arith.addf %323, %13 : vector<4x96xf32>
    %325 = vector.extract_strided_slice %324 {offsets = [0, 0], sizes = [4, 64], strides = [1, 1]} : vector<4x96xf32> to vector<4x64xf32>
    %326 = vector.extract_strided_slice %302 {offsets = [0, 0], sizes = [4, 64], strides = [1, 1]} : vector<4x96xf32> to vector<4x64xf32>
    %327 = arith.addf %325, %326 : vector<4x64xf32>
    %328 = arith.negf %327 : vector<4x64xf32>
    %329 = math.exp %328 : vector<4x64xf32>
    %cst_47 = arith.constant 1.000000e+00 : f32
    %330 = vector.broadcast %cst_47 : f32 to vector<4x64xf32>
    %331 = arith.addf %330, %329 : vector<4x64xf32>
    %332 = arith.divf %330, %331 : vector<4x64xf32>
    %333 = vector.extract_strided_slice %332 {offsets = [0, 0], sizes = [4, 32], strides = [1, 1]} : vector<4x64xf32> to vector<4x32xf32>
    %334 = vector.extract_strided_slice %332 {offsets = [0, 32], sizes = [4, 32], strides = [1, 1]} : vector<4x64xf32> to vector<4x32xf32>
    %335 = vector.extract_strided_slice %324 {offsets = [0, 64], sizes = [4, 32], strides = [1, 1]} : vector<4x96xf32> to vector<4x32xf32>
    %336 = vector.extract_strided_slice %302 {offsets = [0, 64], sizes = [4, 32], strides = [1, 1]} : vector<4x96xf32> to vector<4x32xf32>
    %337 = arith.mulf %333, %336 : vector<4x32xf32>
    %338 = arith.addf %335, %337 : vector<4x32xf32>
    %339 = math.tanh %338 : vector<4x32xf32>
    %340 = arith.mulf %334, %297 : vector<4x32xf32>
    %cst_48 = arith.constant 1.000000e+00 : f32
    %341 = vector.broadcast %cst_48 : f32 to vector<4x32xf32>
    %342 = arith.subf %341, %334 : vector<4x32xf32>
    %343 = arith.mulf %342, %339 : vector<4x32xf32>
    %344 = arith.addf %340, %343 : vector<4x32xf32>
    %345 = vector.extract_strided_slice %11 {offsets = [28, 0], sizes = [4, 96], strides = [1, 1]} : vector<32x96xf32> to vector<4x96xf32>
    %346 = tpu.concatenate %322, %344 in 1 : vector<4x32xf32>, vector<4x32xf32> -> vector<4x64xf32>
    %cst_49 = arith.constant dense<0.000000e+00> : vector<4x256xf32>
    %347 = tpu.matmul %346, %2, %cst_49 {dimension_numbers = #tpu.dot_dimension_numbers<[1], [0], [0], [1], [0, 0, 1, 1], [], []>} : vector<4x64xf32>, vector<64x256xf32>, vector<4x256xf32> -> vector<4x256xf32>
    %348 = vector.extract_strided_slice %347 {offsets = [0, 0], sizes = [4, 96], strides = [1, 1]} : vector<4x256xf32> to vector<4x96xf32>
    %349 = vector.extract_strided_slice %347 {offsets = [0, 128], sizes = [4, 96], strides = [1, 1]} : vector<4x256xf32> to vector<4x96xf32>
    %350 = vector.extract_strided_slice %345 {offsets = [0, 0], sizes = [4, 64], strides = [1, 1]} : vector<4x96xf32> to vector<4x64xf32>
    %351 = vector.extract_strided_slice %348 {offsets = [0, 0], sizes = [4, 64], strides = [1, 1]} : vector<4x96xf32> to vector<4x64xf32>
    %352 = arith.addf %350, %351 : vector<4x64xf32>
    %353 = arith.negf %352 : vector<4x64xf32>
    %354 = math.exp %353 : vector<4x64xf32>
    %cst_50 = arith.constant 1.000000e+00 : f32
    %355 = vector.broadcast %cst_50 : f32 to vector<4x64xf32>
    %356 = arith.addf %355, %354 : vector<4x64xf32>
    %357 = arith.divf %355, %356 : vector<4x64xf32>
    %358 = vector.extract_strided_slice %357 {offsets = [0, 0], sizes = [4, 32], strides = [1, 1]} : vector<4x64xf32> to vector<4x32xf32>
    %359 = vector.extract_strided_slice %357 {offsets = [0, 32], sizes = [4, 32], strides = [1, 1]} : vector<4x64xf32> to vector<4x32xf32>
    %360 = vector.extract_strided_slice %345 {offsets = [0, 64], sizes = [4, 32], strides = [1, 1]} : vector<4x96xf32> to vector<4x32xf32>
    %361 = vector.extract_strided_slice %348 {offsets = [0, 64], sizes = [4, 32], strides = [1, 1]} : vector<4x96xf32> to vector<4x32xf32>
    %362 = arith.mulf %358, %361 : vector<4x32xf32>
    %363 = arith.addf %360, %362 : vector<4x32xf32>
    %364 = math.tanh %363 : vector<4x32xf32>
    %365 = arith.mulf %359, %322 : vector<4x32xf32>
    %cst_51 = arith.constant 1.000000e+00 : f32
    %366 = vector.broadcast %cst_51 : f32 to vector<4x32xf32>
    %367 = arith.subf %366, %359 : vector<4x32xf32>
    %368 = arith.mulf %367, %364 : vector<4x32xf32>
    %369 = arith.addf %365, %368 : vector<4x32xf32>
    %cst_52 = arith.constant dense<0.000000e+00> : vector<4x96xf32>
    %370 = tpu.matmul %369, %4, %cst_52 {dimension_numbers = #tpu.dot_dimension_numbers<[1], [0], [0], [1], [0, 0, 1, 1], [], []>} : vector<4x32xf32>, vector<32x96xf32>, vector<4x96xf32> -> vector<4x96xf32>
    %371 = arith.addf %370, %13 : vector<4x96xf32>
    %372 = vector.extract_strided_slice %371 {offsets = [0, 0], sizes = [4, 64], strides = [1, 1]} : vector<4x96xf32> to vector<4x64xf32>
    %373 = vector.extract_strided_slice %349 {offsets = [0, 0], sizes = [4, 64], strides = [1, 1]} : vector<4x96xf32> to vector<4x64xf32>
    %374 = arith.addf %372, %373 : vector<4x64xf32>
    %375 = arith.negf %374 : vector<4x64xf32>
    %376 = math.exp %375 : vector<4x64xf32>
    %cst_53 = arith.constant 1.000000e+00 : f32
    %377 = vector.broadcast %cst_53 : f32 to vector<4x64xf32>
    %378 = arith.addf %377, %376 : vector<4x64xf32>
    %379 = arith.divf %377, %378 : vector<4x64xf32>
    %380 = vector.extract_strided_slice %379 {offsets = [0, 0], sizes = [4, 32], strides = [1, 1]} : vector<4x64xf32> to vector<4x32xf32>
    %381 = vector.extract_strided_slice %379 {offsets = [0, 32], sizes = [4, 32], strides = [1, 1]} : vector<4x64xf32> to vector<4x32xf32>
    %382 = vector.extract_strided_slice %371 {offsets = [0, 64], sizes = [4, 32], strides = [1, 1]} : vector<4x96xf32> to vector<4x32xf32>
    %383 = vector.extract_strided_slice %349 {offsets = [0, 64], sizes = [4, 32], strides = [1, 1]} : vector<4x96xf32> to vector<4x32xf32>
    %384 = arith.mulf %380, %383 : vector<4x32xf32>
    %385 = arith.addf %382, %384 : vector<4x32xf32>
    %386 = math.tanh %385 : vector<4x32xf32>
    %387 = arith.mulf %381, %344 : vector<4x32xf32>
    %cst_54 = arith.constant 1.000000e+00 : f32
    %388 = vector.broadcast %cst_54 : f32 to vector<4x32xf32>
    %389 = arith.subf %388, %381 : vector<4x32xf32>
    %390 = arith.mulf %389, %386 : vector<4x32xf32>
    %391 = arith.addf %387, %390 : vector<4x32xf32>
    %cst_55 = arith.constant dense<0.000000e+00> : vector<4x96xf32>
    %392 = tpu.matmul %391, %5, %cst_55 {dimension_numbers = #tpu.dot_dimension_numbers<[1], [0], [0], [1], [0, 0, 1, 1], [], []>} : vector<4x32xf32>, vector<32x96xf32>, vector<4x96xf32> -> vector<4x96xf32>
    %393 = vector.broadcast %8 : vector<1x96xf32> to vector<4x96xf32>
    %394 = arith.addf %392, %393 : vector<4x96xf32>
    %395 = vector.extract_strided_slice %394 {offsets = [0, 0], sizes = [4, 10], strides = [1, 1]} : vector<4x96xf32> to vector<4x10xf32>
    %c0_56 = arith.constant 0 : index
    %c0_57 = arith.constant 0 : index
    %396 = vector.load %arg3[%c0_56, %c0_57] : memref<4x10xf32, #tpu.memory_space<vmem>>, vector<4x10xf32>
    tpu.vector_store %arg3[%c0_56, %c0_57], %395 {strides = array<i32>} : memref<4x10xf32, #tpu.memory_space<vmem>>, vector<4x10xf32>,
    return
  }
}

</mosaic_0001>

<bundles_post_ra>
// kernel: tpu_custom_call.1
= control target key start
LH: loop header
LB: loop body
LE: loop exit
PB: predicated region body
PF: predicated region fallthrough
CT: control target
= control target key end

     0   :  { %8 = vsyncpa [#allocation3], 0  ;;  %s2943_s0 = inlined_call_operand.vmem [shape: f32[32,16], index: 0, kind: input, shape index: {}]   ;;  %s2944_s1 = inlined_call_operand.hbm [shape: f32[88,96], index: 1, kind: input, shape index: {}]   ;;  %s2945_s2 = inlined_call_operand.hbm [shape: f32[64,256], index: 2, kind: input, shape index: {}]   ;;  %s2946_s3 = inlined_call_operand.hbm [shape: f32[4,10], index: 3, kind: output, shape index: {}]  }
   0x1   :  { %9 = vsyncpa [#allocation6], 0 }
   0x2   :  { %10 = vsyncpa [#allocation4], 0  ;;  %s2505_s12 = smov [#allocation2]   ;;  %s2433_s16 = scalar_lea.hbm %s2944_s1, 1408 }
   0x3   :  { %s18_s13 = sshll.u32 %s2505_s12, 4  ;;  %p2434_p0 = scmp.ne.s32.totalorder %s2944_s1, %s2433_s16  ;;  %s19_s13 = int_to_ptr.vmem [resolvable:$true] %s18_s13 }
   0x4   :  { %p2437_p1 = scmp.lt.u32.totalorder %s2433_s16, %s2944_s1 }
   0x6   :  { %p2439_p2 = pnand %p2437_p1, %p2434_p0 }
   0x8   :  { %2442 = shalt.err (!%p2439_p2)
}
   0x9   :  { %s2443_s21 = scalar_lea.vmem %s19_s13, 1408  ;;  %p2448_p4 = scmp.lt.s32.totalorder %s19_s13, %s19_s13 }
   0xa   :  { %p2444_p3 = scmp.ne.s32.totalorder %s19_s13, %s2443_s21  ;;  %p2449_p5 = scmp.lt.s32.totalorder %s2443_s21, %s2443_s21 }
   0xc   :  { %p2450_p6 = por %p2449_p5, %p2448_p4 }
   0xe   :  { %p2451_p7 = pnand %p2450_p6, %p2444_p3 }
  0x10   :  { %2454 = shalt.err (!%p2451_p7)
}
  0x11   :  { %s2506_s22 = smov 128   ;;  %s2507_s23 = smov 8  }
  0x12   :  { %24 = dma.hbm_to_vmem [thread:$0]  %s2944_s1, 1408, %s19_s13, [#allocation3], %s2506_s22, %s2506_s22, %s2507_s23  }
  0x13   :  { %s2508_s26 = smov [#allocation5]   ;;  %s2455_s30 = scalar_lea.hbm %s2945_s2, 2048 }
  0x14   :  { %s30_s27 = sshll.u32 %s2508_s26, 4  ;;  %p2456_p8 = scmp.ne.s32.totalorder %s2945_s2, %s2455_s30  ;;  %s31_s27 = int_to_ptr.vmem [resolvable:$true] %s30_s27 }
  0x15   :  { %p2459_p9 = scmp.lt.u32.totalorder %s2455_s30, %s2945_s2 }
  0x17   :  { %p2461_p10 = pnand %p2459_p9, %p2456_p8 }
  0x19   :  { %2464 = shalt.err (!%p2461_p10)
}
  0x1a   :  { %s2465_s8 = scalar_lea.vmem %s31_s27, 2048  ;;  %p2470_p12 = scmp.lt.s32.totalorder %s31_s27, %s31_s27 }
  0x1b   :  { %p2466_p11 = scmp.ne.s32.totalorder %s31_s27, %s2465_s8  ;;  %p2471_p13 = scmp.lt.s32.totalorder %s2465_s8, %s2465_s8 }
  0x1d   :  { %p2472_p0 = por %p2471_p13, %p2470_p12 }
  0x1f   :  { %p2473_p1 = pnand %p2472_p0, %p2466_p11 }
  0x21   :  { %2476 = shalt.err (!%p2473_p1)
}
  0x22   :  { %s2509_s1 = smov 256   ;;  %s2510_s9 = smov 16  }
  0x23   :  { %36 = dma.hbm_to_vmem [thread:$0]  %s2945_s2, 2048, %s31_s27, [#allocation6], %s2509_s1, %s2509_s1, %s2510_s9  }
  0x24   :  { %2499 = dma.done.wait [#allocation3], 1408  }
  0x25   :  { %2500 = vsyncadd [#allocation3], 4294965888 }
  0x26   :  { %2501 = dma.done.wait [#allocation6], 2048  }
  0x27   :  { %2502 = vsyncadd [#allocation6], 4294965248  ;;  %v2511_v0 = vmov 0.0   ;;  %v59_v1 = vld [vmem:[#allocation5 + $0x8] sm:$0xff]  ;;  %v61_v2 = vld [vmem:[#allocation5 + $0x18] sm:$0xff]  ;;  %vm78_vm0 = vcmask 130048   ;;  %v74_v34 = vlaneseq }
  0x28   :  { %248 = vmatprep.mubr.f32.mxu1 %v2511_v0  ;;  %v58_v3 = vld [vmem:[#allocation5] sm:$0xff]  ;;  %v2562_v4 = vpack.c.bf16 %v61_v2, %v59_v1  ;;  %v60_v5 = vld [vmem:[#allocation5 + $0x10] sm:$0xff]  ;;  %v63_v6 = vld [vmem:[#allocation5 + $0x28] sm:$0xff]  ;;  %s2512_s15 = smov 64   ;;  %v2513_v52 = vmov 0.0|0.0   ;;  %vm2514_vm1 = vmmov 0  }
  0x29   :  { %v65_v7 = vld [vmem:[#allocation5 + $0x38] sm:$0xff]  ;;  %v2564_v8 = vpack.c.bf16 %v60_v5, %v58_v3  ;;  %v62_v10 = vld [vmem:[#allocation5 + $0x20] sm:$0xff]  ;;  %v64_v11 = vld [vmem:[#allocation5 + $0x30] sm:$0xff]  ;;  %v2600_v35 = vshrl.u32 %v74_v34, 7  ;;  %vm284_vm2 = vcmask 261120   ;;  %vm180_vm3 = vcmask 523264  }
  0x2a   :  { %v2566_v9 = vpack.c.bf16 %v65_v7, %v63_v6  ;;  %v67_v12 = vld [vmem:[#allocation5 + $0x48] sm:$0xff]  ;;  %2143 = vmatprep.subr.bf16.mxu1 %v2562_v4  ;;  %v69_v13 = vld [vmem:[#allocation5 + $0x58] sm:$0xff]  ;;  %v48_v15 = vld [vmem:[#allocation2 + $0x8] sm:$0xff]  ;;  %v2570_v16 = vpack.c.bf16 %v64_v11, %v62_v10  ;;  %s2516_s20 = smov [#allocation7]   ;;  %vm1924_vm4 = vcmask 76800  }
  0x2b   :  { %v47_v14 = vld [vmem:[#allocation2] sm:$0xff]  ;;  %2145 = vmatpush1.bf16.msra.mxu1 %v2564_v8  ;;  %v2576_v19 = vpack.c.bf16 %v69_v13, %v67_v12  ;;  %v66_v20 = vld [vmem:[#allocation5 + $0x40] sm:$0xff]  ;;  %v68_v21 = vld [vmem:[#allocation5 + $0x50] sm:$0xff]  ;;  %v76_v36 = vsub.s32 0, %v2600_v35  ;;  %v178_v5 = vsub.s32 1, %v2600_v35  ;;  %s1932_s21 = sshll.u32 %s2516_s20, 4  ;;  %s1933_s21 = int_to_ptr.vmem [resolvable:$true] %s1932_s21 }
  0x2c   :  { %v2138_v17 = vpack.c.bf16 %v48_v15, %v47_v14  ;;  %v43_v18 = vld [vmem:[%s2943_s0] sm:$0xff]  ;;  %2147 = vmatprep.subr.bf16.mxu1 %v2566_v9  ;;  %v73_v23 = vld [vmem:[#allocation5 + $0x78] sm:$0xff]  ;;  %v44_v24 = vld [vmem:[%s2943_s0 + $0x8] sm:$0xff]  ;;  %v2583_v25 = vpack.c.bf16 %v68_v21, %v66_v20  ;;  %s2477_s22 = scalar_lea.vmem %s1933_s21, 64  ;;  %p2482_p3 = scmp.lt.s32.totalorder %s1933_s21, %s1933_s21 }
  0x2d   :  { %2033 = vmatprep.mubr.msk.f32.mxu0 %vm78_vm0, %v43_v18  ;;  %v71_v22 = vld [vmem:[#allocation5 + $0x68] sm:$0xff]  ;;  %v70_v27 = vld [vmem:[#allocation5 + $0x60] sm:$0xff]  ;;  %v72_v28 = vld [vmem:[#allocation5 + $0x70] sm:$0xff]  ;;  %p2478_p2 = scmp.ne.s32.totalorder %s1933_s21, %s2477_s22  ;;  %p2483_p4 = scmp.lt.s32.totalorder %s2477_s22, %s2477_s22 }
  0x2e   :  { %2139 = vmatprep.subr.bf16.mxu0 %v2138_v17  ;;  %v2586_v26 = vpack.c.bf16 %v73_v23, %v71_v22  ;;  %v2590_v29 = vpack.c.bf16 %v72_v28, %v70_v27  ;;  %v2603_v37 = vld [vmem:[#allocation2 + $0x50] sm:$0xff]  ;;  %v50_v50 = vld [vmem:[#allocation2 + $0x18] sm:$0xff]  ;;  %v51_v55 = vld [vmem:[#allocation2 + $0x20] sm:$0xff] }
  0x2f   :  { %2141 = vmatpush3.bf16.msra.mxu0 %v2138_v17  ;;  %2149 = vmatpush1.bf16.msra.mxu1 %v2570_v16  ;;  %v2606_v38 = vrot.slane %v2603_v37, %v76_v36  ;;  %v49_v49 = vld [vmem:[#allocation2 + $0x10] sm:$0xff]  ;;  %v46_v54 = vld [vmem:[%s2943_s0 + $0x18] sm:$0xff]  ;;  %v52_v56 = vld [vmem:[#allocation2 + $0x28] sm:$0xff]  ;;  %v2663_v6 = vrot.slane %v2603_v37, %v178_v5  ;;  %p2484_p5 = por %p2483_p4, %p2482_p3 }
  0x30   :  { %2151 = vmatprep.subr.bf16.mxu1 %v2576_v19  ;;  %v45_v51 = vld [vmem:[%s2943_s0 + $0x10] sm:$0xff]  ;;  %2158 = vmatprep.subr.bf16.mxu0 %v2513_v52  ;;  %v2620_v53 = vpack.c.bf16 %v50_v50, %v49_v49  ;;  %v2629_v57 = vpack.c.bf16 %v52_v56, %v51_v55  ;;  %s2515_s0 = smov 96  }
  0x31   :  { %p2485_p6 = pnand %p2484_p5, %p2478_p2 }
  0x32   :  { %2034 = vmatmul.mubr.msk.f32.vlgmr.msra.gmra.mrb[0].mxu0 %vm78_vm0, %v44_v24 }
  0x33   :  { %2153 = vmatpush1.bf16.msra.mxu1 %v2583_v25  ;;  %2036 = vmatprep.mubr.msk.f32.mxu0 %vm78_vm0, %v45_v51 }
  0x34   :  { %2155 = vmatprep.subr.bf16.mxu1 %v2586_v26  ;;  %2160 = vmatpush3.bf16.msra.mxu0 %v2620_v53 }
  0x35   :  { %2161 = vmatprep.subr.bf16.mxu0 %v2513_v52 }
  0x36   :  { %2037 = vmatmul.mubr.msk.f32.gmra.mrb[2].mxu0 %vm78_vm0, %v46_v54 }
  0x37   :  { %2157 = vmatpush1.bf16.msra.mxu1 %v2590_v29  ;;  %2047 = vmatprep.mubr.msk.f32.mxu0 %vm2514_vm1, %v2511_v0 }
  0x38   :  { %2180 = vmatprep.subr.bf16.mxu1 %v2513_v52  ;;  %2163 = vmatpush3.bf16.msra.mxu0 %v2629_v57 }
  0x39   :  { %2165 = vmatprep.subr.bf16.mxu0 %v2562_v4 }
  0x3a   :  { %249 = vmatmul.mubr.f32.vlgmr.msra.gmra.mrb[0].mxu1 %v2511_v0 }
  0x3b   :  { %2182 = vmatpush3.bf16.msra.mxu1 %v2620_v53  ;;  %2058 = vmatprep.mubr.msk.f32.mxu1 %vm2514_vm1, %v2511_v0 }
  0x3c   :  { %2183 = vmatprep.subr.bf16.mxu1 %v2513_v52 }
  0x3f   :  { %2185 = vmatpush3.bf16.msra.mxu1 %v2629_v57 }
  0x40   :  { %2187 = vmatprep.subr.bf16.mxu1 %v2562_v4 }
 0x105   :  { %v2595_v30 = vpop.f32.mrb[0].mxu0 }
 0x106   :  { %v157_v31 = vpop.f32.mrb[1].mxu0 }
 0x107   :  { %v2609_v39 = vadd.f32 %v157_v31, %v2606_v38 }
 0x109   :  { %v2647_v1 = vpop.f32.mrb[2].mxu0 }
 0x10a   :  { %v2649_v2 = vpop.f32.mrb[3].mxu0 }
 0x10d   :  { %v250_v32 = vpop.f32.mrb[0].mxu1 }
 0x10e   :  { %263 = vrot.lane.b32.xlu0 %v250_v32, %s2512_s15  ;;  %v2598_v33 = vpop.f32.mrb[1].mxu1  ;;  %v255_v40 = vadd.f32 %v250_v32, %v2609_v39 }
 0x110   :  { %v1946_v41 = vmul.f32 -1.442695, %v255_v40 }
 0x112   :  { %2336 = vpow2.f32 %v1946_v41 }
 0x11c   :  { %v2337_v42 = vpop.eup %2336 }
 0x11d   :  { %v259_v43 = vadd.f32 1.0, %v2337_v42 }
 0x11f   :  { %2338 = vrcp.f32 %v259_v43 }
 0x129   :  { %v2339_v44 = vpop.eup %2338 }
 0x12a   :  { %v274_v59 = vsub.f32 1.0, %v2339_v44  ;;  %v273_v61 = vmul.f32 0.0, %v2339_v44 }
 0x180   :  { %v264_v45 = vpop.permute.xlu0 %263 }
 0x181   :  { %v266_v46 = vmul.f32 %v2339_v44, %v264_v45 }
 0x183   :  { %268 = vrot.lane.b32.xlu0 %v266_v46, %s2512_s15 }
 0x187   :  { %365 = vrot.lane.b32.xlu0 %v2598_v33, %s2512_s15 }
 0x1f5   :  { %v269_v47 = vpop.permute.xlu0 %268 }
 0x1f6   :  { %v271_v48 = vadd.f32 %v269_v47, %v2609_v39 }
 0x1f8   :  { %2340 = vtanh.f32 %v271_v48 }
 0x1f9   :  { %v366_v18 = vpop.permute.xlu0 %365 }
 0x202   :  { %v2341_v58 = vpop.eup %2340 }
 0x203   :  { %276 = vrot.lane.b32.xlu1 %v2341_v58, %s2515_s0 }
 0x275   :  { %v277_v60 = vpop.permute.xlu1 %276 }
 0x276   :  { %v279_v62 = vmul.f32 %v277_v60, %v274_v59 }
 0x278   :  { %v2643_v63 = vadd.f32 %v279_v62, %v273_v61 }
 0x27a   :  { %282 = vrot.lane.b32.xlu1 %v2643_v63, %s2515_s0  ;;  %v479_v50 = vrot.slane %v2643_v63, 4 }
 0x2ec   :  { %v283_v3 = vpop.permute.xlu1 %282 }
 0x2ed   :  { %2048 = vmatmul.mubr.msk.f32.vlgmr.msra.gmra.mrb[4].mxu0 %vm284_vm2, %v283_v3 }
 0x2ee   :  { %2167 = vmatpush1.bf16.msra.mxu0 %v2564_v8  ;;  %452 = vmatprep.mubr.f32.mxu0 %v2511_v0 }
 0x2ef   :  { %2169 = vmatprep.subr.bf16.mxu0 %v2566_v9 }
 0x2f2   :  { %2171 = vmatpush1.bf16.msra.mxu0 %v2570_v16 }
 0x2f3   :  { %2173 = vmatprep.subr.bf16.mxu0 %v2576_v19 }
 0x2f6   :  { %2175 = vmatpush1.bf16.msra.mxu0 %v2583_v25 }
 0x2f7   :  { %2177 = vmatprep.subr.bf16.mxu0 %v2586_v26 }
 0x2fa   :  { %2179 = vmatpush1.bf16.msra.mxu0 %v2590_v29 }
 0x2fb   :  { %2202 = vmatprep.subr.bf16.mxu0 %v2513_v52 }
 0x3c0   :  { %v353_v7 = vpop.f32.mrb[4].mxu0 }
 0x3c1   :  { %v354_v10 = vadd.f32 %v353_v7, %v2663_v6  ;;  %v2049_v11 = vpop.f32.mrb[5].mxu0 }
 0x3c3   :  { %v357_v12 = vadd.f32 %v354_v10, %v2598_v33 }
 0x3c5   :  { %v1948_v13 = vmul.f32 -1.442695, %v357_v12 }
 0x3c7   :  { %2342 = vpow2.f32 %v1948_v13 }
 0x3d1   :  { %v2343_v14 = vpop.eup %2342 }
 0x3d2   :  { %v361_v15 = vadd.f32 1.0, %v2343_v14 }
 0x3d4   :  { %2344 = vrcp.f32 %v361_v15 }
 0x3de   :  { %v2345_v17 = vpop.eup %2344 }
 0x3df   :  { %v368_v20 = vmul.f32 %v2345_v17, %v366_v18  ;;  %v376_v24 = vsub.f32 1.0, %v2345_v17  ;;  %v375_v28 = vmul.f32 0.0, %v2345_v17 }
 0x3e1   :  { %370 = vrot.lane.b32.xlu1 %v368_v20, %s2512_s15 }
 0x453   :  { %v371_v21 = vpop.permute.xlu1 %370 }
 0x454   :  { %v373_v22 = vadd.f32 %v371_v21, %v354_v10 }
 0x456   :  { %2346 = vtanh.f32 %v373_v22 }
 0x460   :  { %v2347_v23 = vpop.eup %2346 }
 0x461   :  { %378 = vrot.lane.b32.xlu0 %v2347_v23, %s2515_s0 }
 0x4d3   :  { %v379_v27 = vpop.permute.xlu0 %378 }
 0x4d4   :  { %v381_v31 = vmul.f32 %v379_v27, %v376_v24 }
 0x4d6   :  { %v2669_v32 = vadd.f32 %v381_v31, %v375_v28 }
 0x4d8   :  { %v384_v33 = vsel %vm284_vm2, %v283_v3, %v2669_v32 }
 0x4d9   :  { %1949 = vmatmul.mubr.msk.f32.vlgmr.msra.gmra.mrb[6].mxu0 %vm180_vm3, %v384_v33  ;;  %v2723_v33 = vadd.f32 %v2595_v30, %v2606_v38 }
 0x4da   :  { %2204 = vmatpush3.bf16.msra.mxu0 %v2620_v53  ;;  %2069 = vmatprep.mubr.msk.f32.mxu0 %vm2514_vm1, %v2511_v0 }
 0x4db   :  { %2205 = vmatprep.subr.bf16.mxu0 %v2513_v52 }
 0x4de   :  { %2207 = vmatpush3.bf16.msra.mxu0 %v2629_v57 }
 0x4df   :  { %2209 = vmatprep.subr.bf16.mxu0 %v2562_v4 }
 0x5ac   :  { %v454_v34 = vpop.f32.mrb[6].mxu0 }
 0x5ad   :  { %v460_v36 = vrot.slane %v454_v34, 4  ;;  %v456_v37 = vpop.f32.mrb[7].mxu0 }
 0x5af   :  { %469 = vrot.lane.b32.xlu1 %v460_v36, %s2512_s15  ;;  %v462_v40 = vadd.f32 %v460_v36, %v2609_v39 }
 0x5b1   :  { %v1950_v41 = vmul.f32 -1.442695, %v462_v40 }
 0x5b3   :  { %2348 = vpow2.f32 %v1950_v41 }
 0x5bd   :  { %v2349_v42 = vpop.eup %2348 }
 0x5be   :  { %v466_v43 = vadd.f32 1.0, %v2349_v42 }
 0x5c0   :  { %2350 = vrcp.f32 %v466_v43 }
 0x5ca   :  { %v2351_v44 = vpop.eup %2350 }
 0x5cb   :  { %v482_v51 = vsub.f32 1.0, %v2351_v44  ;;  %v481_v55 = vmul.f32 %v2351_v44, %v479_v50 }
 0x621   :  { %v470_v45 = vpop.permute.xlu1 %469 }
 0x622   :  { %v472_v46 = vmul.f32 %v2351_v44, %v470_v45 }
 0x624   :  { %474 = vrot.lane.b32.xlu0 %v472_v46, %s2512_s15 }
 0x696   :  { %v475_v47 = vpop.permute.xlu0 %474 }
 0x697   :  { %v477_v48 = vadd.f32 %v475_v47, %v2609_v39 }
 0x699   :  { %2352 = vtanh.f32 %v477_v48 }
 0x6a3   :  { %v2353_v49 = vpop.eup %2352 }
 0x6a4   :  { %484 = vrot.lane.b32.xlu1 %v2353_v49, %s2515_s0 }
 0x6a8   :  { %573 = vrot.lane.b32.xlu1 %v456_v37, %s2512_s15 }
 0x716   :  { %v485_v54 = vpop.permute.xlu1 %484 }
 0x717   :  { %v487_v56 = vmul.f32 %v485_v54, %v482_v51 }
 0x719   :  { %v2687_v58 = vadd.f32 %v487_v56, %v481_v55 }
 0x71a   :  { %v574_v11 = vpop.permute.xlu1 %573 }
 0x71b   :  { %v490_v59 = vrot.slane %v2687_v58, 4 }
 0x71d   :  { %491 = vrot.lane.b32.xlu0 %v490_v59, %s2515_s0 }
 0x78f   :  { %v492_v39 = vpop.permute.xlu0 %491 }
 0x790   :  { %2059 = vmatmul.mubr.msk.f32.vlgmr.msra.gmra.mrb[2].mxu1 %vm284_vm2, %v492_v39 }
 0x791   :  { %2189 = vmatpush1.bf16.msra.mxu1 %v2564_v8  ;;  %666 = vmatprep.mubr.f32.mxu1 %v2511_v0 }
 0x792   :  { %2191 = vmatprep.subr.bf16.mxu1 %v2566_v9 }
 0x795   :  { %2193 = vmatpush1.bf16.msra.mxu1 %v2570_v16 }
 0x796   :  { %2195 = vmatprep.subr.bf16.mxu1 %v2576_v19 }
 0x799   :  { %2197 = vmatpush1.bf16.msra.mxu1 %v2583_v25 }
 0x79a   :  { %2199 = vmatprep.subr.bf16.mxu1 %v2586_v26 }
 0x79d   :  { %2201 = vmatpush1.bf16.msra.mxu1 %v2590_v29 }
 0x79e   :  { %2224 = vmatprep.subr.bf16.mxu1 %v2513_v52 }
 0x863   :  { %v561_v60 = vpop.f32.mrb[2].mxu1 }
 0x864   :  { %v562_v61 = vadd.f32 %v561_v60, %v2663_v6  ;;  %v2060_v62 = vpop.f32.mrb[3].mxu1 }
 0x866   :  { %v565_v63 = vadd.f32 %v562_v61, %v456_v37 }
 0x868   :  { %v1952_v3 = vmul.f32 -1.442695, %v565_v63 }
 0x86a   :  { %2354 = vpow2.f32 %v1952_v3 }
 0x874   :  { %v2355_v5 = vpop.eup %2354 }
 0x875   :  { %v569_v7 = vadd.f32 1.0, %v2355_v5 }
 0x877   :  { %2356 = vrcp.f32 %v569_v7 }
 0x881   :  { %v2357_v10 = vpop.eup %2356 }
 0x882   :  { %v576_v12 = vmul.f32 %v2357_v10, %v574_v11  ;;  %v584_v17 = vsub.f32 1.0, %v2357_v10  ;;  %v583_v20 = vmul.f32 %v2357_v10, %v2669_v32 }
 0x884   :  { %578 = vrot.lane.b32.xlu0 %v576_v12, %s2512_s15 }
 0x888   :  { %591 = vrot.lane.b32.xlu0 %v2687_v58, %s2515_s0 }
 0x8f6   :  { %v579_v13 = vpop.permute.xlu0 %578 }
 0x8f7   :  { %v581_v14 = vadd.f32 %v579_v13, %v562_v61 }
 0x8f9   :  { %2358 = vtanh.f32 %v581_v14 }
 0x8fa   :  { %v592_v24 = vpop.permute.xlu0 %591 }
 0x903   :  { %v2359_v15 = vpop.eup %2358 }
 0x904   :  { %586 = vrot.lane.b32.xlu1 %v2359_v15, %s2515_s0 }
 0x976   :  { %v587_v18 = vpop.permute.xlu1 %586 }
 0x977   :  { %v589_v21 = vmul.f32 %v587_v18, %v584_v17 }
 0x979   :  { %v2709_v22 = vadd.f32 %v589_v21, %v583_v20 }
 0x97b   :  { %v595_v23 = vrot.slane %v2709_v22, 4 }
 0x97d   :  { %v597_v27 = vsel %vm284_vm2, %v592_v24, %v595_v23 }
 0x97e   :  { %v599_v28 = vrot.slane %v597_v27, 4 }
 0x980   :  { %1953 = vmatmul.mubr.msk.f32.vlgmr.msra.gmra.mrb[4].mxu1 %vm180_vm3, %v599_v28 }
 0x981   :  { %2226 = vmatpush3.bf16.msra.mxu1 %v2620_v53  ;;  %2080 = vmatprep.mubr.msk.f32.mxu1 %vm2514_vm1, %v2511_v0 }
 0x982   :  { %2227 = vmatprep.subr.bf16.mxu1 %v2513_v52 }
 0x985   :  { %2229 = vmatpush3.bf16.msra.mxu1 %v2629_v57 }
 0x986   :  { %2231 = vmatprep.subr.bf16.mxu1 %v2562_v4 }
 0xa53   :  { %v668_v31 = vpop.f32.mrb[4].mxu1 }
 0xa54   :  { %681 = vrot.lane.b32.xlu1 %v668_v31, %s2512_s15  ;;  %v670_v32 = vpop.f32.mrb[5].mxu1  ;;  %v673_v34 = vadd.f32 %v668_v31, %v2723_v33 }
 0xa56   :  { %v1954_v36 = vmul.f32 -1.442695, %v673_v34 }
 0xa58   :  { %2360 = vpow2.f32 %v1954_v36 }
 0xa62   :  { %v2361_v37 = vpop.eup %2360 }
 0xa63   :  { %v677_v40 = vadd.f32 1.0, %v2361_v37 }
 0xa65   :  { %2362 = vrcp.f32 %v677_v40 }
 0xa6f   :  { %v2363_v41 = vpop.eup %2362 }
 0xa70   :  { %v693_v30 = vsub.f32 1.0, %v2363_v41  ;;  %v692_v48 = vmul.f32 %v2363_v41, %v490_v59 }
 0xac6   :  { %v682_v42 = vpop.permute.xlu1 %681 }
 0xac7   :  { %v684_v43 = vmul.f32 %v2363_v41, %v682_v42 }
 0xac9   :  { %686 = vrot.lane.b32.xlu0 %v684_v43, %s2512_s15 }
 0xb3b   :  { %v687_v44 = vpop.permute.xlu0 %686 }
 0xb3c   :  { %v689_v45 = vadd.f32 %v687_v44, %v2723_v33 }
 0xb3e   :  { %2364 = vtanh.f32 %v689_v45 }
 0xb48   :  { %v2365_v46 = vpop.eup %2364 }
 0xb49   :  { %695 = vrot.lane.b32.xlu1 %v2365_v46, %s2515_s0 }
 0xb4d   :  { %783 = vrot.lane.b32.xlu1 %v670_v32, %s2512_s15 }
 0xbbb   :  { %v696_v47 = vpop.permute.xlu1 %695 }
 0xbbc   :  { %v698_v49 = vmul.f32 %v696_v47, %v693_v30 }
 0xbbe   :  { %v2732_v50 = vadd.f32 %v698_v49, %v692_v48 }
 0xbbf   :  { %v784_v62 = vpop.permute.xlu1 %783 }
 0xbc0   :  { %701 = vrot.lane.b32.xlu0 %v2732_v50, %s2515_s0  ;;  %v897_v37 = vrot.slane %v2732_v50, 4 }
 0xc32   :  { %v702_v51 = vpop.permute.xlu0 %701 }
 0xc33   :  { %2070 = vmatmul.mubr.msk.f32.vlgmr.msra.gmra.mrb[8].mxu0 %vm284_vm2, %v702_v51 }
 0xc34   :  { %2211 = vmatpush1.bf16.msra.mxu0 %v2564_v8  ;;  %870 = vmatprep.mubr.f32.mxu0 %v2511_v0 }
 0xc35   :  { %2213 = vmatprep.subr.bf16.mxu0 %v2566_v9 }
 0xc38   :  { %2215 = vmatpush1.bf16.msra.mxu0 %v2570_v16 }
 0xc39   :  { %2217 = vmatprep.subr.bf16.mxu0 %v2576_v19 }
 0xc3c   :  { %2219 = vmatpush1.bf16.msra.mxu0 %v2583_v25 }
 0xc3d   :  { %2221 = vmatprep.subr.bf16.mxu0 %v2586_v26 }
 0xc40   :  { %2223 = vmatpush1.bf16.msra.mxu0 %v2590_v29 }
 0xc41   :  { %2246 = vmatprep.subr.bf16.mxu0 %v2513_v52 }
 0xd06   :  { %v771_v54 = vpop.f32.mrb[8].mxu0 }
 0xd07   :  { %v772_v55 = vadd.f32 %v771_v54, %v2663_v6  ;;  %v2071_v56 = vpop.f32.mrb[9].mxu0 }
 0xd09   :  { %v775_v58 = vadd.f32 %v772_v55, %v670_v32 }
 0xd0b   :  { %v1956_v59 = vmul.f32 -1.442695, %v775_v58 }
 0xd0d   :  { %2366 = vpow2.f32 %v1956_v59 }
 0xd17   :  { %v2367_v39 = vpop.eup %2366 }
 0xd18   :  { %v779_v60 = vadd.f32 1.0, %v2367_v39 }
 0xd1a   :  { %2368 = vrcp.f32 %v779_v60 }
 0xd24   :  { %v2369_v61 = vpop.eup %2368 }
 0xd25   :  { %v786_v63 = vmul.f32 %v2369_v61, %v784_v62  ;;  %v794_v10 = vsub.f32 1.0, %v2369_v61  ;;  %v793_v12 = vmul.f32 %v2369_v61, %v2709_v22 }
 0xd27   :  { %788 = vrot.lane.b32.xlu0 %v786_v63, %s2512_s15 }
 0xd99   :  { %v789_v3 = vpop.permute.xlu0 %788 }
 0xd9a   :  { %v791_v5 = vadd.f32 %v789_v3, %v772_v55 }
 0xd9c   :  { %2370 = vtanh.f32 %v791_v5 }
 0xda6   :  { %v2371_v7 = vpop.eup %2370 }
 0xda7   :  { %796 = vrot.lane.b32.xlu1 %v2371_v7, %s2515_s0 }
 0xe19   :  { %v797_v11 = vpop.permute.xlu1 %796 }
 0xe1a   :  { %v799_v13 = vmul.f32 %v797_v11, %v794_v10 }
 0xe1c   :  { %v2750_v14 = vadd.f32 %v799_v13, %v793_v12 }
 0xe1e   :  { %v802_v15 = vsel %vm284_vm2, %v702_v51, %v2750_v14 }
 0xe1f   :  { %1957 = vmatmul.mubr.msk.f32.vlgmr.msra.gmra.mrb[10].mxu0 %vm180_vm3, %v802_v15 }
 0xe20   :  { %2248 = vmatpush3.bf16.msra.mxu0 %v2620_v53  ;;  %2091 = vmatprep.mubr.msk.f32.mxu0 %vm2514_vm1, %v2511_v0 }
 0xe21   :  { %2249 = vmatprep.subr.bf16.mxu0 %v2513_v52 }
 0xe24   :  { %2251 = vmatpush3.bf16.msra.mxu0 %v2629_v57 }
 0xe25   :  { %2253 = vmatprep.subr.bf16.mxu0 %v2562_v4 }
 0xef2   :  { %v872_v17 = vpop.f32.mrb[10].mxu0 }
 0xef3   :  { %v878_v18 = vrot.slane %v872_v17, 4  ;;  %v874_v20 = vpop.f32.mrb[11].mxu0 }
 0xef5   :  { %887 = vrot.lane.b32.xlu0 %v878_v18, %s2512_s15  ;;  %v880_v21 = vadd.f32 %v878_v18, %v2723_v33 }
 0xef7   :  { %v1958_v22 = vmul.f32 -1.442695, %v880_v21 }
 0xef9   :  { %2372 = vpow2.f32 %v1958_v22 }
 0xf03   :  { %v2373_v23 = vpop.eup %2372 }
 0xf04   :  { %v884_v24 = vadd.f32 1.0, %v2373_v23 }
 0xf06   :  { %2374 = vrcp.f32 %v884_v24 }
 0xf10   :  { %v2375_v27 = vpop.eup %2374 }
 0xf11   :  { %v900_v40 = vsub.f32 1.0, %v2375_v27  ;;  %v899_v42 = vmul.f32 %v2375_v27, %v897_v37 }
 0xf67   :  { %v888_v28 = vpop.permute.xlu0 %887 }
 0xf68   :  { %v890_v31 = vmul.f32 %v2375_v27, %v888_v28 }
 0xf6a   :  { %892 = vrot.lane.b32.xlu1 %v890_v31, %s2512_s15 }
 0xfdc   :  { %v893_v32 = vpop.permute.xlu1 %892 }
 0xfdd   :  { %v895_v34 = vadd.f32 %v893_v32, %v2723_v33 }
 0xfdf   :  { %2376 = vtanh.f32 %v895_v34 }
 0xfe9   :  { %v2377_v36 = vpop.eup %2376 }
 0xfea   :  { %902 = vrot.lane.b32.xlu0 %v2377_v36, %s2515_s0 }
 0xfee   :  { %991 = vrot.lane.b32.xlu0 %v874_v20, %s2512_s15 }
0x105c   :  { %v903_v41 = vpop.permute.xlu0 %902 }
0x105d   :  { %v905_v43 = vmul.f32 %v903_v41, %v900_v40 }
0x105f   :  { %v2768_v44 = vadd.f32 %v905_v43, %v899_v42 }
0x1060   :  { %v992_v55 = vpop.permute.xlu0 %991 }
0x1061   :  { %v908_v45 = vrot.slane %v2768_v44, 4 }
0x1063   :  { %909 = vrot.lane.b32.xlu1 %v908_v45, %s2515_s0 }
0x10d5   :  { %v910_v33 = vpop.permute.xlu1 %909 }
0x10d6   :  { %2081 = vmatmul.mubr.msk.f32.vlgmr.msra.gmra.mrb[6].mxu1 %vm284_vm2, %v910_v33 }
0x10d7   :  { %2233 = vmatpush1.bf16.msra.mxu1 %v2564_v8  ;;  %1084 = vmatprep.mubr.f32.mxu1 %v2511_v0 }
0x10d8   :  { %2235 = vmatprep.subr.bf16.mxu1 %v2566_v9 }
0x10db   :  { %2237 = vmatpush1.bf16.msra.mxu1 %v2570_v16 }
0x10dc   :  { %2239 = vmatprep.subr.bf16.mxu1 %v2576_v19 }
0x10df   :  { %2241 = vmatpush1.bf16.msra.mxu1 %v2583_v25 }
0x10e0   :  { %2243 = vmatprep.subr.bf16.mxu1 %v2586_v26 }
0x10e3   :  { %2245 = vmatpush1.bf16.msra.mxu1 %v2590_v29 }
0x10e4   :  { %2268 = vmatprep.subr.bf16.mxu1 %v2513_v52 }
0x11a9   :  { %v979_v46 = vpop.f32.mrb[6].mxu1 }
0x11aa   :  { %v980_v30 = vadd.f32 %v979_v46, %v2663_v6  ;;  %v2082_v47 = vpop.f32.mrb[7].mxu1 }
0x11ac   :  { %v983_v48 = vadd.f32 %v980_v30, %v874_v20 }
0x11ae   :  { %v1960_v49 = vmul.f32 -1.442695, %v983_v48 }
0x11b0   :  { %2378 = vpow2.f32 %v1960_v49 }
0x11ba   :  { %v2379_v50 = vpop.eup %2378 }
0x11bb   :  { %v987_v51 = vadd.f32 1.0, %v2379_v50 }
0x11bd   :  { %2380 = vrcp.f32 %v987_v51 }
0x11c7   :  { %v2381_v54 = vpop.eup %2380 }
0x11c8   :  { %v994_v56 = vmul.f32 %v2381_v54, %v992_v55  ;;  %v1002_v60 = vsub.f32 1.0, %v2381_v54  ;;  %v1001_v62 = vmul.f32 %v2381_v54, %v2750_v14  ;;  %v2804_v14 = vadd.f32 %v2649_v2, %v2606_v38 }
0x11ca   :  { %996 = vrot.lane.b32.xlu1 %v994_v56, %s2512_s15 }
0x11ce   :  { %1009 = vrot.lane.b32.xlu1 %v2768_v44, %s2515_s0 }
0x123c   :  { %v997_v58 = vpop.permute.xlu1 %996 }
0x123d   :  { %v999_v59 = vadd.f32 %v997_v58, %v980_v30 }
0x123f   :  { %2382 = vtanh.f32 %v999_v59 }
0x1240   :  { %v1010_v7 = vpop.permute.xlu1 %1009 }
0x1249   :  { %v2383_v39 = vpop.eup %2382 }
0x124a   :  { %1004 = vrot.lane.b32.xlu0 %v2383_v39, %s2515_s0 }
0x12bc   :  { %v1005_v61 = vpop.permute.xlu0 %1004 }
0x12bd   :  { %v1007_v63 = vmul.f32 %v1005_v61, %v1002_v60 }
0x12bf   :  { %v2790_v3 = vadd.f32 %v1007_v63, %v1001_v62 }
0x12c1   :  { %v1013_v5 = vrot.slane %v2790_v3, 4 }
0x12c3   :  { %v1015_v10 = vsel %vm284_vm2, %v1010_v7, %v1013_v5 }
0x12c4   :  { %v1017_v11 = vrot.slane %v1015_v10, 4 }
0x12c6   :  { %1961 = vmatmul.mubr.msk.f32.vlgmr.msra.gmra.mrb[8].mxu1 %vm180_vm3, %v1017_v11 }
0x12c7   :  { %2270 = vmatpush3.bf16.msra.mxu1 %v2620_v53  ;;  %2102 = vmatprep.mubr.msk.f32.mxu1 %vm2514_vm1, %v2511_v0 }
0x12c8   :  { %2271 = vmatprep.subr.bf16.mxu1 %v2513_v52 }
0x12cb   :  { %2273 = vmatpush3.bf16.msra.mxu1 %v2629_v57 }
0x12cc   :  { %2275 = vmatprep.subr.bf16.mxu1 %v2562_v4 }
0x1399   :  { %v1086_v12 = vpop.f32.mrb[8].mxu1 }
0x139a   :  { %1099 = vrot.lane.b32.xlu0 %v1086_v12, %s2512_s15  ;;  %v1088_v13 = vpop.f32.mrb[9].mxu1  ;;  %v1091_v15 = vadd.f32 %v1086_v12, %v2804_v14 }
0x139c   :  { %v1962_v17 = vmul.f32 -1.442695, %v1091_v15 }
0x139e   :  { %2384 = vpow2.f32 %v1962_v17 }
0x13a8   :  { %v2385_v18 = vpop.eup %2384 }
0x13a9   :  { %v1095_v20 = vadd.f32 1.0, %v2385_v18 }
0x13ab   :  { %2386 = vrcp.f32 %v1095_v20 }
0x13b5   :  { %v2387_v21 = vpop.eup %2386 }
0x13b6   :  { %v1111_v2 = vsub.f32 1.0, %v2387_v21  ;;  %v1110_v32 = vmul.f32 %v2387_v21, %v908_v45 }
0x140c   :  { %v1100_v22 = vpop.permute.xlu0 %1099 }
0x140d   :  { %v1102_v23 = vmul.f32 %v2387_v21, %v1100_v22 }
0x140f   :  { %1104 = vrot.lane.b32.xlu1 %v1102_v23, %s2512_s15 }
0x1481   :  { %v1105_v24 = vpop.permute.xlu1 %1104 }
0x1482   :  { %v1107_v27 = vadd.f32 %v1105_v24, %v2804_v14 }
0x1484   :  { %2388 = vtanh.f32 %v1107_v27 }
0x148e   :  { %v2389_v28 = vpop.eup %2388 }
0x148f   :  { %1113 = vrot.lane.b32.xlu0 %v2389_v28, %s2515_s0 }
0x1493   :  { %1201 = vrot.lane.b32.xlu0 %v1088_v13, %s2512_s15 }
0x1501   :  { %v1114_v31 = vpop.permute.xlu0 %1113 }
0x1502   :  { %v1116_v34 = vmul.f32 %v1114_v31, %v1111_v2 }
0x1504   :  { %v2813_v36 = vadd.f32 %v1116_v34, %v1110_v32 }
0x1505   :  { %v1202_v30 = vpop.permute.xlu0 %1201 }
0x1506   :  { %1119 = vrot.lane.b32.xlu1 %v2813_v36, %s2515_s0  ;;  %v1315_v15 = vrot.slane %v2813_v36, 4 }
0x1578   :  { %v1120_v37 = vpop.permute.xlu1 %1119 }
0x1579   :  { %2092 = vmatmul.mubr.msk.f32.vlgmr.msra.gmra.mrb[12].mxu0 %vm284_vm2, %v1120_v37 }
0x157a   :  { %2255 = vmatpush1.bf16.msra.mxu0 %v2564_v8  ;;  %1288 = vmatprep.mubr.f32.mxu0 %v2511_v0 }
0x157b   :  { %2257 = vmatprep.subr.bf16.mxu0 %v2566_v9 }
0x157e   :  { %2259 = vmatpush1.bf16.msra.mxu0 %v2570_v16 }
0x157f   :  { %2261 = vmatprep.subr.bf16.mxu0 %v2576_v19 }
0x1582   :  { %2263 = vmatpush1.bf16.msra.mxu0 %v2583_v25 }
0x1583   :  { %2265 = vmatprep.subr.bf16.mxu0 %v2586_v26 }
0x1586   :  { %2267 = vmatpush1.bf16.msra.mxu0 %v2590_v29 }
0x1587   :  { %2290 = vmatprep.subr.bf16.mxu0 %v2513_v52 }
0x164c   :  { %v1189_v40 = vpop.f32.mrb[12].mxu0 }
0x164d   :  { %v1190_v41 = vadd.f32 %v1189_v40, %v2663_v6  ;;  %v2093_v42 = vpop.f32.mrb[13].mxu0 }
0x164f   :  { %v1193_v43 = vadd.f32 %v1190_v41, %v1088_v13 }
0x1651   :  { %v1964_v44 = vmul.f32 -1.442695, %v1193_v43 }
0x1653   :  { %2390 = vpow2.f32 %v1964_v44 }
0x165d   :  { %v2391_v45 = vpop.eup %2390 }
0x165e   :  { %v1197_v33 = vadd.f32 1.0, %v2391_v45 }
0x1660   :  { %2392 = vrcp.f32 %v1197_v33 }
0x166a   :  { %v2393_v46 = vpop.eup %2392 }
0x166b   :  { %v1204_v47 = vmul.f32 %v2393_v46, %v1202_v30  ;;  %v1212_v51 = vsub.f32 1.0, %v2393_v46  ;;  %v1211_v55 = vmul.f32 %v2393_v46, %v2790_v3 }
0x166d   :  { %1206 = vrot.lane.b32.xlu1 %v1204_v47, %s2512_s15 }
0x16df   :  { %v1207_v48 = vpop.permute.xlu1 %1206 }
0x16e0   :  { %v1209_v49 = vadd.f32 %v1207_v48, %v1190_v41 }
0x16e2   :  { %2394 = vtanh.f32 %v1209_v49 }
0x16ec   :  { %v2395_v50 = vpop.eup %2394 }
0x16ed   :  { %1214 = vrot.lane.b32.xlu0 %v2395_v50, %s2515_s0 }
0x175f   :  { %v1215_v54 = vpop.permute.xlu0 %1214 }
0x1760   :  { %v1217_v56 = vmul.f32 %v1215_v54, %v1212_v51 }
0x1762   :  { %v2831_v58 = vadd.f32 %v1217_v56, %v1211_v55  ;;  %v2885_v55 = vadd.f32 %v2647_v1, %v2606_v38 }
0x1764   :  { %v1220_v59 = vsel %vm284_vm2, %v1120_v37, %v2831_v58 }
0x1765   :  { %1965 = vmatmul.mubr.msk.f32.vlgmr.msra.gmra.mrb[14].mxu0 %vm180_vm3, %v1220_v59 }
0x1766   :  { %2292 = vmatpush3.bf16.msra.mxu0 %v2620_v53  ;;  %2113 = vmatprep.mubr.msk.f32.mxu0 %vm2514_vm1, %v2511_v0 }
0x1767   :  { %2293 = vmatprep.subr.bf16.mxu0 %v2513_v52 }
0x176a   :  { %2295 = vmatpush3.bf16.msra.mxu0 %v2629_v57 }
0x176b   :  { %2297 = vmatprep.subr.bf16.mxu0 %v2562_v4 }
0x1838   :  { %v1290_v39 = vpop.f32.mrb[14].mxu0 }
0x1839   :  { %v1296_v60 = vrot.slane %v1290_v39, 4  ;;  %v1292_v61 = vpop.f32.mrb[15].mxu0 }
0x183b   :  { %1305 = vrot.lane.b32.xlu1 %v1296_v60, %s2512_s15  ;;  %v1298_v62 = vadd.f32 %v1296_v60, %v2804_v14 }
0x183d   :  { %v1966_v63 = vmul.f32 -1.442695, %v1298_v62 }
0x183f   :  { %2396 = vpow2.f32 %v1966_v63 }
0x1849   :  { %v2397_v3 = vpop.eup %2396 }
0x184a   :  { %v1302_v5 = vadd.f32 1.0, %v2397_v3 }
0x184c   :  { %2398 = vrcp.f32 %v1302_v5 }
0x1856   :  { %v2399_v7 = vpop.eup %2398 }
0x1857   :  { %v1318_v17 = vsub.f32 1.0, %v2399_v7  ;;  %v1317_v20 = vmul.f32 %v2399_v7, %v1315_v15 }
0x18ad   :  { %v1306_v10 = vpop.permute.xlu1 %1305 }
0x18ae   :  { %v1308_v11 = vmul.f32 %v2399_v7, %v1306_v10 }
0x18b0   :  { %1310 = vrot.lane.b32.xlu0 %v1308_v11, %s2512_s15 }
0x1922   :  { %v1311_v12 = vpop.permute.xlu0 %1310 }
0x1923   :  { %v1313_v4 = vadd.f32 %v1311_v12, %v2804_v14 }
0x1925   :  { %2400 = vtanh.f32 %v1313_v4 }
0x192f   :  { %v2401_v13 = vpop.eup %2400 }
0x1930   :  { %1320 = vrot.lane.b32.xlu1 %v2401_v13, %s2515_s0 }
0x1934   :  { %1409 = vrot.lane.b32.xlu1 %v1292_v61, %s2512_s15 }
0x19a2   :  { %v1321_v18 = vpop.permute.xlu1 %1320 }
0x19a3   :  { %v1323_v21 = vmul.f32 %v1321_v18, %v1318_v17 }
0x19a5   :  { %v2849_v22 = vadd.f32 %v1323_v21, %v1317_v20 }
0x19a6   :  { %v1410_v37 = vpop.permute.xlu1 %1409 }
0x19a7   :  { %v1326_v23 = vrot.slane %v2849_v22, 4 }
0x19a9   :  { %1327 = vrot.lane.b32.xlu0 %v1326_v23, %s2515_s0 }
0x1a1b   :  { %v1328_v14 = vpop.permute.xlu0 %1327 }
0x1a1c   :  { %2103 = vmatmul.mubr.msk.f32.vlgmr.msra.gmra.mrb[10].mxu1 %vm284_vm2, %v1328_v14 }
0x1a1d   :  { %2277 = vmatpush1.bf16.msra.mxu1 %v2564_v8  ;;  %1502 = vmatprep.mubr.f32.mxu1 %v2511_v0 }
0x1a1e   :  { %2279 = vmatprep.subr.bf16.mxu1 %v2566_v9 }
0x1a21   :  { %2281 = vmatpush1.bf16.msra.mxu1 %v2570_v16 }
0x1a22   :  { %2283 = vmatprep.subr.bf16.mxu1 %v2576_v19 }
0x1a25   :  { %2285 = vmatpush1.bf16.msra.mxu1 %v2583_v25 }
0x1a26   :  { %2287 = vmatprep.subr.bf16.mxu1 %v2586_v26 }
0x1a29   :  { %2289 = vmatpush1.bf16.msra.mxu1 %v2590_v29 }
0x1a2a   :  { %2312 = vmatprep.subr.bf16.mxu1 %v2513_v52 }
0x1aef   :  { %v1397_v24 = vpop.f32.mrb[10].mxu1 }
0x1af0   :  { %v1398_v27 = vadd.f32 %v1397_v24, %v2663_v6  ;;  %v2104_v28 = vpop.f32.mrb[11].mxu1 }
0x1af2   :  { %v1401_v2 = vadd.f32 %v1398_v27, %v1292_v61 }
0x1af4   :  { %v1968_v31 = vmul.f32 -1.442695, %v1401_v2 }
0x1af6   :  { %2402 = vpow2.f32 %v1968_v31 }
0x1b00   :  { %v2403_v32 = vpop.eup %2402 }
0x1b01   :  { %v1405_v34 = vadd.f32 1.0, %v2403_v32 }
0x1b03   :  { %2404 = vrcp.f32 %v1405_v34 }
0x1b0d   :  { %v2405_v36 = vpop.eup %2404 }
0x1b0e   :  { %v1412_v40 = vmul.f32 %v2405_v36, %v1410_v37  ;;  %v1420_v44 = vsub.f32 1.0, %v2405_v36  ;;  %v1419_v33 = vmul.f32 %v2405_v36, %v2831_v58 }
0x1b10   :  { %1414 = vrot.lane.b32.xlu0 %v1412_v40, %s2512_s15 }
0x1b14   :  { %1427 = vrot.lane.b32.xlu0 %v2849_v22, %s2515_s0 }
0x1b82   :  { %v1415_v41 = vpop.permute.xlu0 %1414 }
0x1b83   :  { %v1417_v42 = vadd.f32 %v1415_v41, %v1398_v27 }
0x1b85   :  { %2406 = vtanh.f32 %v1417_v42 }
0x1b86   :  { %v1428_v48 = vpop.permute.xlu0 %1427 }
0x1b8f   :  { %v2407_v43 = vpop.eup %2406 }
0x1b90   :  { %1422 = vrot.lane.b32.xlu1 %v2407_v43, %s2515_s0 }
0x1c02   :  { %v1423_v45 = vpop.permute.xlu1 %1422 }
0x1c03   :  { %v1425_v46 = vmul.f32 %v1423_v45, %v1420_v44 }
0x1c05   :  { %v2871_v30 = vadd.f32 %v1425_v46, %v1419_v33 }
0x1c07   :  { %v1431_v47 = vrot.slane %v2871_v30, 4 }
0x1c09   :  { %v1433_v49 = vsel %vm284_vm2, %v1428_v48, %v1431_v47 }
0x1c0a   :  { %v1435_v50 = vrot.slane %v1433_v49, 4 }
0x1c0c   :  { %1969 = vmatmul.mubr.msk.f32.vlgmr.msra.gmra.mrb[12].mxu1 %vm180_vm3, %v1435_v50 }
0x1c0d   :  { %2314 = vmatpush3.bf16.msra.mxu1 %v2620_v53  ;;  %2124 = vmatprep.mubr.msk.f32.mxu1 %vm2514_vm1, %v2511_v0 }
0x1c0e   :  { %2315 = vmatprep.subr.bf16.mxu1 %v2513_v52 }
0x1c11   :  { %2317 = vmatpush3.bf16.msra.mxu1 %v2629_v57 }
0x1c12   :  { %2318 = vmatprep.subr.bf16.mxu1 %v2513_v52 }
0x1cdf   :  { %v1504_v51 = vpop.f32.mrb[12].mxu1 }
0x1ce0   :  { %1517 = vrot.lane.b32.xlu1 %v1504_v51, %s2512_s15  ;;  %v1506_v54 = vpop.f32.mrb[13].mxu1  ;;  %v1509_v56 = vadd.f32 %v1504_v51, %v2885_v55 }
0x1ce2   :  { %v1970_v53 = vmul.f32 -1.442695, %v1509_v56 }
0x1ce4   :  { %2408 = vpow2.f32 %v1970_v53 }
0x1cee   :  { %v2409_v58 = vpop.eup %2408 }
0x1cef   :  { %v1513_v59 = vadd.f32 1.0, %v2409_v58 }
0x1cf1   :  { %2410 = vrcp.f32 %v1513_v59 }
0x1cfb   :  { %v2411_v39 = vpop.eup %2410 }
0x1cfc   :  { %v1529_v38 = vsub.f32 1.0, %v2411_v39  ;;  %v1528_v3 = vmul.f32 %v2411_v39, %v1326_v23 }
0x1d52   :  { %v1518_v60 = vpop.permute.xlu1 %1517 }
0x1d53   :  { %v1520_v57 = vmul.f32 %v2411_v39, %v1518_v60 }
0x1d55   :  { %1522 = vrot.lane.b32.xlu0 %v1520_v57, %s2512_s15 }
0x1dc7   :  { %v1523_v61 = vpop.permute.xlu0 %1522 }
0x1dc8   :  { %v1525_v62 = vadd.f32 %v1523_v61, %v2885_v55 }
0x1dca   :  { %2412 = vtanh.f32 %v1525_v62  ;;  %v53_v62 = vld [vmem:[#allocation2 + $0x30] sm:$0xff] }
0x1dd4   :  { %v2413_v63 = vpop.eup %2412 }
0x1dd5   :  { %1531 = vrot.lane.b32.xlu1 %v2413_v63, %s2515_s0  ;;  %v55_v63 = vld [vmem:[#allocation2 + $0x40] sm:$0xff] }
0x1dd9   :  { %1619 = vrot.lane.b32.xlu1 %v1506_v54, %s2512_s15 }
0x1e47   :  { %v1532_v1 = vpop.permute.xlu1 %1531 }
0x1e48   :  { %v1534_v5 = vmul.f32 %v1532_v1, %v1529_v38 }
0x1e4a   :  { %v1535_v7 = vadd.f32 %v1534_v5, %v1528_v3 }
0x1e4c   :  { %1537 = vrot.lane.b32.xlu0 %v1535_v7, %s2515_s0  ;;  %v1733_v44 = vrot.slane %v1535_v7, 4 }
0x1ebe   :  { %v1538_v10 = vpop.permute.xlu0 %1537 }
0x1ebf   :  { %2114 = vmatmul.mubr.msk.f32.vlgmr.msra.gmra.mrb[16].mxu0 %vm284_vm2, %v1538_v10 }
0x1ec0   :  { %2299 = vmatpush1.bf16.msra.mxu0 %v2564_v8  ;;  %1706 = vmatprep.mubr.f32.mxu0 %v2511_v0 }
0x1ec1   :  { %2301 = vmatprep.subr.bf16.mxu0 %v2566_v9 }
0x1ec4   :  { %2303 = vmatpush1.bf16.msra.mxu0 %v2570_v16  ;;  %v1620_v16 = vpop.permute.xlu1 %1619 }
0x1ec5   :  { %2305 = vmatprep.subr.bf16.mxu0 %v2576_v19 }
0x1ec8   :  { %2307 = vmatpush1.bf16.msra.mxu0 %v2583_v25 }
0x1ec9   :  { %2309 = vmatprep.subr.bf16.mxu0 %v2586_v26 }
0x1ecc   :  { %2311 = vmatpush1.bf16.msra.mxu0 %v2590_v29 }
0x1f92   :  { %v1607_v11 = vpop.f32.mrb[16].mxu0 }
0x1f93   :  { %v1608_v12 = vadd.f32 %v1607_v11, %v2663_v6  ;;  %v2115_v4 = vpop.f32.mrb[17].mxu0 }
0x1f95   :  { %v1611_v13 = vadd.f32 %v1608_v12, %v1506_v54 }
0x1f97   :  { %v1972_v8 = vmul.f32 -1.442695, %v1611_v13  ;;  %v1847_v13 = vsub.s32 2, %v2600_v35 }
0x1f99   :  { %2414 = vpow2.f32 %v1972_v8  ;;  %v2432_v8 = vld [vmem:[#allocation2 + $0x50] sm:$0xff] }
0x1fa3   :  { %v2415_v15 = vpop.eup %2414 }
0x1fa4   :  { %v1615_v17 = vadd.f32 1.0, %v2415_v15  ;;  %v1848_v15 = vrot.slane %v2432_v8, %v1847_v13 }
0x1fa6   :  { %2416 = vrcp.f32 %v1615_v17 }
0x1fb0   :  { %v2417_v9 = vpop.eup %2416 }
0x1fb1   :  { %v1622_v18 = vmul.f32 %v2417_v9, %v1620_v16  ;;  %v1630_v29 = vsub.f32 1.0, %v2417_v9  ;;  %v1629_v21 = vmul.f32 %v2417_v9, %v2871_v30 }
0x1fb3   :  { %1624 = vrot.lane.b32.xlu0 %v1622_v18, %s2512_s15 }
0x2025   :  { %v1625_v19 = vpop.permute.xlu0 %1624 }
0x2026   :  { %v1627_v25 = vadd.f32 %v1625_v19, %v1608_v12 }
0x2028   :  { %2418 = vtanh.f32 %v1627_v25 }
0x2032   :  { %v2419_v26 = vpop.eup %2418 }
0x2033   :  { %1632 = vrot.lane.b32.xlu1 %v2419_v26, %s2515_s0 }
0x20a5   :  { %v1633_v20 = vpop.permute.xlu1 %1632 }
0x20a6   :  { %v1635_v22 = vmul.f32 %v1633_v20, %v1630_v29 }
0x20a8   :  { %v2908_v23 = vadd.f32 %v1635_v22, %v1629_v21 }
0x20aa   :  { %v1638_v14 = vsel %vm284_vm2, %v1538_v10, %v2908_v23 }
0x20ab   :  { %1973 = vmatmul.mubr.msk.f32.vlgmr.msra.gmra.mrb[18].mxu0 %vm180_vm3, %v1638_v14 }
0x217e   :  { %v1708_v24 = vpop.f32.mrb[18].mxu0 }
0x217f   :  { %v1714_v27 = vrot.slane %v1708_v24, 4  ;;  %v1710_v28 = vpop.f32.mrb[19].mxu0 }
0x2181   :  { %1723 = vrot.lane.b32.xlu0 %v1714_v27, %s2512_s15  ;;  %v1716_v2 = vadd.f32 %v1714_v27, %v2885_v55 }
0x2183   :  { %v1974_v31 = vmul.f32 -1.442695, %v1716_v2 }
0x2185   :  { %2420 = vpow2.f32 %v1974_v31 }
0x218f   :  { %v2421_v32 = vpop.eup %2420 }
0x2190   :  { %v1720_v34 = vadd.f32 1.0, %v2421_v32 }
0x2192   :  { %2422 = vrcp.f32 %v1720_v34 }
0x219c   :  { %v2423_v36 = vpop.eup %2422 }
0x219d   :  { %v1736_v45 = vsub.f32 1.0, %v2423_v36  ;;  %v1735_v46 = vmul.f32 %v2423_v36, %v1733_v44 }
0x21f3   :  { %v1724_v37 = vpop.permute.xlu0 %1723 }
0x21f4   :  { %v1726_v40 = vmul.f32 %v2423_v36, %v1724_v37 }
0x21f6   :  { %1728 = vrot.lane.b32.xlu1 %v1726_v40, %s2512_s15 }
0x2268   :  { %v1729_v41 = vpop.permute.xlu1 %1728 }
0x2269   :  { %v1731_v42 = vadd.f32 %v1729_v41, %v2885_v55 }
0x226b   :  { %2424 = vtanh.f32 %v1731_v42 }
0x2275   :  { %v2425_v43 = vpop.eup %2424 }
0x2276   :  { %1738 = vrot.lane.b32.xlu0 %v2425_v43, %s2515_s0 }
0x227a   :  { %1827 = vrot.lane.b32.xlu0 %v1710_v28, %s2512_s15 }
0x22e8   :  { %v1739_v33 = vpop.permute.xlu0 %1738 }
0x22e9   :  { %v1741_v30 = vmul.f32 %v1739_v33, %v1736_v45 }
0x22eb   :  { %v1742_v47 = vadd.f32 %v1741_v30, %v1735_v46 }
0x22ec   :  { %v1828_v39 = vpop.permute.xlu0 %1827 }
0x22ed   :  { %v1744_v48 = vrot.slane %v1742_v47, 4 }
0x22ef   :  { %1745 = vrot.lane.b32.xlu1 %v1744_v48, %s2515_s0 }
0x2361   :  { %v1746_v49 = vpop.permute.xlu1 %1745 }
0x2362   :  { %2125 = vmatmul.mubr.msk.f32.vlgmr.msra.gmra.mrb[14].mxu1 %vm284_vm2, %v1746_v49 }
0x2363   :  { %2135 = vmatprep.mubr.msk.f32.mxu1 %vm2514_vm1, %v2511_v0  ;;  %v54_v0 = vld [vmem:[#allocation2 + $0x38] sm:$0xff] }
0x2364   :  { %v2319_v38 = vpack.c.bf16 %v54_v0, %v53_v62 }
0x2366   :  { %2320 = vmatpush3.bf16.msra.mxu1 %v2319_v38 }
0x2367   :  { %2321 = vmatprep.subr.bf16.mxu1 %v2513_v52 }
0x2435   :  { %v1815_v50 = vpop.f32.mrb[14].mxu1 }
0x2436   :  { %v1816_v51 = vadd.f32 %v1815_v50, %v2663_v6  ;;  %v2126_v54 = vpop.f32.mrb[15].mxu1  ;;  %v56_v6 = vld [vmem:[#allocation2 + $0x48] sm:$0xff] }
0x2437   :  { %v2322_v1 = vpack.c.bf16 %v56_v6, %v55_v63 }
0x2438   :  { %v1819_v55 = vadd.f32 %v1816_v51, %v1710_v28 }
0x2439   :  { %2323 = vmatpush3.bf16.msra.mxu1 %v2322_v1 }
0x243a   :  { %v1976_v56 = vmul.f32 -1.442695, %v1819_v55 }
0x243c   :  { %2426 = vpow2.f32 %v1976_v56 }
0x2446   :  { %v2427_v53 = vpop.eup %2426 }
0x2447   :  { %v1823_v58 = vadd.f32 1.0, %v2427_v53 }
0x2449   :  { %2428 = vrcp.f32 %v1823_v58 }
0x2453   :  { %v2429_v59 = vpop.eup %2428 }
0x2454   :  { %v1830_v60 = vmul.f32 %v2429_v59, %v1828_v39  ;;  %v1838_v5 = vsub.f32 1.0, %v2429_v59  ;;  %v1837_v10 = vmul.f32 %v2429_v59, %v2908_v23 }
0x2456   :  { %1832 = vrot.lane.b32.xlu1 %v1830_v60, %s2512_s15 }
0x24c8   :  { %v1833_v57 = vpop.permute.xlu1 %1832 }
0x24c9   :  { %v1835_v61 = vadd.f32 %v1833_v57, %v1816_v51 }
0x24cb   :  { %2430 = vtanh.f32 %v1835_v61 }
0x24d5   :  { %v2431_v3 = vpop.eup %2430 }
0x24d6   :  { %1840 = vrot.lane.b32.xlu0 %v2431_v3, %s2515_s0 }
0x2548   :  { %v1841_v7 = vpop.permute.xlu0 %1840 }
0x2549   :  { %v1843_v11 = vmul.f32 %v1841_v7, %v1838_v5 }
0x254b   :  { %v1844_v12 = vadd.f32 %v1843_v11, %v1837_v10 }
0x254d   :  { %1850 = vrot.lane.b32.xlu1 %v1844_v12, %s2515_s0 }
0x25bf   :  { %v1851_v4 = vpop.permute.xlu1 %1850 }
0x25c0   :  { %2136 = vmatmul.mubr.msk.f32.vlgmr.msra.gmra.mrb[16].mxu1 %vm284_vm2, %v1851_v4 }
0x2693   :  { %v1920_v52 = vpop.f32.mrb[16].mxu1 }
0x2694   :  { %v1921_v17 = vadd.f32 %v1920_v52, %v1848_v15  ;;  %v2137_v9 = vpop.f32.mrb[17].mxu1 }
0x2696   :  { %1925 = vst.msk [vmem:[#allocation7] sm:$0xf] %vm1924_vm4, %v1921_v17 }
0x2697   :  { %2488 = shalt.err (!%p2485_p6)
}
0x2698   :  { %s2489_s25 = scalar_lea.hbm %s2946_s3, 64 }
0x2699   :  { %p2490_p7 = scmp.ne.s32.totalorder %s2946_s3, %s2489_s25  ;;  %p2493_p8 = scmp.lt.u32.totalorder %s2489_s25, %s2946_s3 }
0x269b   :  { %p2495_p9 = pnand %p2493_p8, %p2490_p7 }
0x269d   :  { %2498 = shalt.err (!%p2495_p9)
}
0x269e   :  { %1935 = dma.vmem_to_hbm [thread:$0]  %s1933_s21, 64, %s2946_s3, [#allocation4]  }
0x269f   :  { %2503 = dma.done.wait [#allocation4], 64  }
0x26a0   :  { %2504 = vsyncadd [#allocation4], 4294967232 }
0x26a1   :  { %1939 = vsyncpa [#allocation3], 1 }
0x26a2   :  { %1940 = vsyncpa [#allocation6], 1 }
0x26a3   :  { %1941 = vsyncpa [#allocation4], 1 }

</bundles_post_ra>
